<compile_context>
chip_gen: v7x
topology: tpu7x:2x2x1
jax: 0.10.0
libtpu: 0.0.40
codegen_flags: <defaults>
</compile_context>

<pallas_src>
import functools
import math

import jax
import jax.numpy as jnp
from jax.experimental import pallas as pl
from jax.experimental.pallas import tpu as pltpu


# ------------------------------ helpers ------------------------------------

_VMEM_LIMIT = 48 * 1024 * 1024


def _round_up(x, m):
    return ((x + m - 1) // m) * m


def im2col_3d(x, ksize=3, stride=2, pad=1):
    """x:(B,C,D,H,W) -> bf16 (B, Do*Ho*Wo, C*k^3) patches (spatial row-major)."""
    x = x.astype(jnp.bfloat16)
    B, C, D, H, W = x.shape
    xp = jnp.pad(x, ((0, 0), (0, 0), (pad, pad), (pad, pad), (pad, pad)))
    Do = (D + 2 * pad - ksize) // stride + 1
    Ho = (H + 2 * pad - ksize) // stride + 1
    Wo = (W + 2 * pad - ksize) // stride + 1
    cols = []
    for kd in range(ksize):
        for kh in range(ksize):
            for kw in range(ksize):
                cols.append(xp[:, :,
                               kd:kd + Do * stride:stride,
                               kh:kh + Ho * stride:stride,
                               kw:kw + Wo * stride:stride])
    col = jnp.stack(cols, axis=2)                       # (B,C,27,Do,Ho,Wo)
    col = col.transpose(0, 3, 4, 5, 1, 2).reshape(B, Do * Ho * Wo, C * ksize ** 3)
    return col, (Do, Ho, Wo)


# --------------------- stage 1: conv1 + BN + ReLU ---------------------------

def _conv1_kernel(col_ref, w_ref, b_ref, o_ref, *, m_valid, need_mask):
    """One (modality, batch, M-tile): (tm,K)@(K,dim)+b, ReLU, channels-first store."""
    x = col_ref[...][0, 0]                               # (tm, K) bf16
    w = w_ref[...][0]                                    # (K, dim) bf16
    tm = x.shape[0]
    y = jnp.dot(x, w, preferred_element_type=jnp.float32)   # (tm, dim) f32
    y = jnp.maximum(y + b_ref[...][0], 0.0)
    if need_mask:
        row = jax.lax.broadcasted_iota(jnp.int32, (tm, 1), 0) + pl.program_id(2) * tm
        y = jnp.where(row < m_valid, y, 0.0)
    # lane-dense channels-first output: (dim, tm)
    o_ref[...] = y.T.astype(o_ref.dtype)[None, None]


def conv1_forward(cols, w, b):
    """cols:(2,B,M,K) bf16, w:(2,K,dim) bf16, b:(2,1,dim) f32 -> (2,B,dim,M) bf16."""
    G, B, M, K = cols.shape
    dim = w.shape[-1]
    cap = 4096
    if M <= cap:                                  # fast path: Mp == M, no slice needed
        tm, Mp, need_mask = M, M, False
    else:
        tm = 2048                                 # multiple of 128 (lane-dense output)
        Mp = _round_up(M, tm)
        need_mask = Mp != M
        if need_mask:
            cols = jnp.pad(cols, ((0, 0), (0, 0), (0, Mp - M), (0, 0)))
    n_mt = Mp // tm
    out = pl.pallas_call(
        functools.partial(_conv1_kernel, m_valid=M, need_mask=need_mask),
        out_shape=jax.ShapeDtypeStruct((G, B, dim, Mp), jnp.bfloat16),
        grid=(G, B, n_mt),
        in_specs=[
            pl.BlockSpec((1, 1, tm, K), lambda g, b, t: (g, b, t, 0)),
            pl.BlockSpec((1, K, dim), lambda g, b, t: (g, 0, 0)),
            pl.BlockSpec((1, 1, dim), lambda g, b, t: (g, 0, 0)),
        ],
        out_specs=pl.BlockSpec((1, 1, dim, tm), lambda g, b, t: (g, b, 0, t)),
        compiler_params=pltpu.CompilerParams(
            dimension_semantics=("parallel", "parallel", "parallel"),
            vmem_limit_bytes=_VMEM_LIMIT),
    )(cols, w, b)
    if Mp != M:
        out = out[..., :M]
    return out


# --------- stage 2: conv2 + BN + ReLU + GAP + full head (one launch) --------

def _conv2_gap_head_kernel(col_ref, w_ref, b_ref,
                           wd1_ref, bd1_ref, wd2_ref, bd2_ref,
                           wf1_ref, bf1_ref, wf2_ref, bf2_ref,
                           cls_ref, dmri_ref, dpet_ref,
                           mm_acc, gap_acc, *, m2_valid, need_mask, dim):
    mt = pl.program_id(0)
    kt = pl.program_id(1)
    n_mt = pl.num_programs(0)
    n_kt = pl.num_programs(1)

    @pl.when(jnp.logical_and(mt == 0, kt == 0))
    def _init_gap():
        gap_acc[...] = jnp.zeros_like(gap_acc)

    @pl.when(kt == 0)
    def _init_mm():
        mm_acc[...] = jnp.zeros_like(mm_acc)

    x = col_ref[...]                              # (G, B, tm, tk) bf16
    G, Bb, tm, tk = x.shape
    w = w_ref[...]                                # (G, tk, dim) bf16
    for g in range(G):                            # static loop: 2 modalities, 2 weights
        y = jnp.dot(x[g].reshape(Bb * tm, tk), w[g],
                    preferred_element_type=jnp.float32)
        mm_acc[g] = mm_acc[g] + y.reshape(Bb, tm, dim)

    @pl.when(kt == n_kt - 1)
    def _gap_update():
        bias = b_ref[...][:, None, :, :]          # (G,1,1,dim)
        y = jnp.maximum(mm_acc[...] + bias, 0.0)  # (G,B,tm,dim) f32
        if need_mask:
            row = jax.lax.broadcasted_iota(jnp.int32, (1, 1, tm, 1), 2) + mt * tm
            y = jnp.where(row < m2_valid, y, 0.0)
        gap_acc[...] += jnp.sum(y, axis=2)        # (G,B,dim) partial spatial sum

    @pl.when(jnp.logical_and(mt == n_mt - 1, kt == n_kt - 1))
    def _head():
        gap = gap_acc[...] * (1.0 / m2_valid)     # (G,B,dim) f32  == AdaptiveAvgPool3d(1)
        g_m = gap[0]                              # (B, dim)  (revgrad = identity forward)
        g_p = gap[1]
        wd1 = wd1_ref[...]; bd1 = bd1_ref[...]
        wd2 = wd2_ref[...]; bd2 = bd2_ref[...]
        h_m = jnp.maximum(jnp.dot(g_m, wd1, preferred_element_type=jnp.float32) + bd1, 0.0)
        h_p = jnp.maximum(jnp.dot(g_p, wd1, preferred_element_type=jnp.float32) + bd1, 0.0)
        dmri_ref[...] = jnp.dot(h_m, wd2, preferred_element_type=jnp.float32) + bd2
        dpet_ref[...] = jnp.dot(h_p, wd2, preferred_element_type=jnp.float32) + bd2
        # fc_cls on concat([mri_gap, pet_gap]) as a split matmul (no concat op)
        wf1 = wf1_ref[...]
        h_c = (jnp.dot(g_m, wf1[:dim], preferred_element_type=jnp.float32)
               + jnp.dot(g_p, wf1[dim:], preferred_element_type=jnp.float32)
               + bf1_ref[...])
        h_c = jnp.maximum(h_c, 0.0)
        cls_ref[...] = (jnp.dot(h_c, wf2_ref[...], preferred_element_type=jnp.float32)
                        + bf2_ref[...])


def _resident_spec(shape):
    nd = len(shape)
    return pl.BlockSpec(tuple(shape), lambda mt, kt, _nd=nd: (0,) * _nd)


def conv2_gap_head_forward(cols, w, b, hp):
    """cols:(2,B,M2,K2) bf16, w:(2,K2,dim) bf16 -> (cls, d_mri, d_pet), each (B,2)."""
    G, B, M2, K2 = cols.shape
    dim = w.shape[-1]

    # K tiling: pad K2 to a multiple of 128; stream (tm, tk) blocks when K2 is large
    tk_cap = 1792
    K2p = _round_up(K2, 128)
    if K2p > tk_cap:
        tk = tk_cap
        K2p = _round_up(K2, tk)
    else:
        tk = K2p
    if K2p != K2:
        cols = jnp.pad(cols, ((0, 0), (0, 0), (0, 0), (0, K2p - K2)))
        w = jnp.pad(w, ((0, 0), (0, K2p - K2), (0, 0)))
    n_kt = K2p // tk

    # M tiling (spatial rows of conv2 output, reduced by the GAP accumulator)
    tm_cap = 512
    if M2 <= tm_cap:
        tm, M2p, need_mask = M2, M2, False
    else:
        tm = tm_cap
        M2p = _round_up(M2, tm)
        need_mask = M2p != M2
        if need_mask:
            cols = jnp.pad(cols, ((0, 0), (0, 0), (0, M2p - M2), (0, 0)))
    n_mt = M2p // tm

    kernel = functools.partial(_conv2_gap_head_kernel, m2_valid=M2,
                               need_mask=need_mask, dim=dim)
    out_sd = jax.ShapeDtypeStruct((B, 2), jnp.float32)
    out_spec = pl.BlockSpec((B, 2), lambda mt, kt: (0, 0))
    return pl.pallas_call(
        kernel,
        out_shape=(out_sd, out_sd, out_sd),
        grid=(n_mt, n_kt),
        in_specs=[
            pl.BlockSpec((G, B, tm, tk), lambda mt, kt: (0, 0, mt, kt)),
            pl.BlockSpec((G, tk, dim), lambda mt, kt: (0, kt, 0)),
            pl.BlockSpec((G, 1, dim), lambda mt, kt: (0, 0, 0)),
            _resident_spec(hp["wd1"].shape), _resident_spec(hp["bd1"].shape),
            _resident_spec(hp["wd2"].shape), _resident_spec(hp["bd2"].shape),
            _resident_spec(hp["wf1"].shape), _resident_spec(hp["bf1"].shape),
            _resident_spec(hp["wf2"].shape), _resident_spec(hp["bf2"].shape),
        ],
        out_specs=(out_spec, out_spec, out_spec),
        scratch_shapes=[pltpu.VMEM((G, B, tm, dim), jnp.float32),   # matmul K-partials
                        pltpu.VMEM((G, B, dim), jnp.float32)],      # GAP accumulator
        compiler_params=pltpu.CompilerParams(
            # "arbitrary" on purpose: the head reads a scratch that spans the whole grid
            dimension_semantics=("arbitrary", "arbitrary"),
            vmem_limit_bytes=_VMEM_LIMIT),
    )(cols, w, b, hp["wd1"], hp["bd1"], hp["wd2"], hp["bd2"],
      hp["wf1"], hp["bf1"], hp["wf2"], hp["bf2"])


# ------------------------------- forward ------------------------------------

def model_cnn_ad_forward(mri, pet, params):
    """Returns (output_logits, D_MRI_logits, D_PET_logits), each (B, 2)."""
    B = mri.shape[0]
    w1 = params["w1"]                      # (2, K1pad, dim) bf16
    K1p = w1.shape[1]

    # ---- stage 1: conv1 + BN(folded) + ReLU, both modalities, one launch ----
    cols_m, (D1, H1, W1) = im2col_3d(mri)                   # (B, M1, 27) bf16
    cols_p, _ = im2col_3d(pet)
    M1, K1 = cols_m.shape[1], cols_m.shape[2]
    cols1 = jnp.stack([cols_m, cols_p], axis=0)             # (2, B, M1, 27)
    cols1 = jnp.pad(cols1, ((0, 0), (0, 0), (0, 0), (0, K1p - K1)))   # K 27->32
    act1 = conv1_forward(cols1, w1, params["b1"])           # (2, B, dim, M1) bf16

    # channels-first output -> NCDHW is a free reshape (no HBM transpose pass)
    dim = act1.shape[2]
    feat1 = act1.reshape(2 * B, dim, D1, H1, W1)

    # ---- stage 2: conv2 + BN + ReLU + GAP + whole head, one launch ----
    cols2, _ = im2col_3d(feat1)                              # (2B, M2, dim*27) bf16
    M2, K2 = cols2.shape[1], cols2.shape[2]
    cols2 = cols2.reshape(2, B, M2, K2)
    cls_logits, d_mri, d_pet = conv2_gap_head_forward(
        cols2, params["w2"], params["b2"], params["head"])
    return cls_logits, d_mri, d_pet


# ----------------------------- parameter init -------------------------------

def init_params(key, dim):
    keys = iter(jax.random.split(key, 16))

    def nrm(shape, std):
        return jax.random.normal(next(keys), shape, jnp.float32) * std

    bn_s = 1.0 / math.sqrt(1.0 + 1e-5)   # BN at init: gamma=1, beta=0, mean=0, var=1
    K1, K1p = 27, 32
    K2 = dim * 27

    def conv1_w():
        w = nrm((K1, dim), math.sqrt(2.0 / (dim * 27))) * bn_s   # kaiming fan_out + BN fold
        return jnp.pad(w, ((0, K1p - K1), (0, 0)))               # zero-pad K 27->32

    def conv2_w():
        return nrm((K2, dim), math.sqrt(2.0 / (dim * 27))) * bn_s

    params = {
        "w1": jnp.stack([conv1_w(), conv1_w()], axis=0).astype(jnp.bfloat16),  # (2,32,dim)
        "b1": jnp.zeros((2, 1, dim), jnp.float32),
        "w2": jnp.stack([conv2_w(), conv2_w()], axis=0).astype(jnp.bfloat16),  # (2,dim*27,dim)
        "b2": jnp.zeros((2, 1, dim), jnp.float32),
        "head": {
            # D: Linear(dim,128) (BatchNorm1d folded, eval stats) -> ReLU -> Linear(128,2)
            "wd1": nrm((dim, 128), 1.0 / math.sqrt(dim)) * bn_s,
            "bd1": jnp.zeros((1, 128), jnp.float32),
            "wd2": nrm((128, 2), 1.0 / math.sqrt(128)),
            "bd2": jnp.zeros((1, 2), jnp.float32),
            # fc_cls: Linear(2*dim,128) -> ReLU -> Linear(128,2)
            "wf1": nrm((2 * dim, 128), 1.0 / math.sqrt(2 * dim)),
            "bf1": jnp.zeros((1, 128), jnp.float32),
            "wf2": nrm((128, 2), 1.0 / math.sqrt(128)),
            "bf2": jnp.zeros((1, 2), jnp.float32),
        },
    }
    return params


# ---------------------------------- main ------------------------------------

if __name__ == "__main__":
    dim = 32

    key = jax.random.PRNGKey(0)
    k_param, k_mri, k_pet = jax.random.split(key, 3)
    params = init_params(k_param, dim)

    # small 3D volumes: (batch=2, channels=1, 8x8x8)
    mri = jax.random.normal(k_mri, (2, 1, 8, 8, 8), jnp.float32)
    pet = jax.random.normal(k_pet, (2, 1, 8, 8, 8), jnp.float32)

    fwd = jax.jit(model_cnn_ad_forward)
    cls_logits, d_mri, d_pet = fwd(mri, pet, params)
    jax.block_until_ready((cls_logits, d_mri, d_pet))
    assert cls_logits.shape == (2, 2)
    assert d_mri.shape == (2, 2) and d_pet.shape == (2, 2)
    assert bool(jnp.all(jnp.isfinite(cls_logits)))
    print("KERNEL_OK")
</pallas_src>

<mosaic_0001>
module attributes {stable_mosaic.version = 11 : i64} {
  func.func @_conv1_kernel(%arg0: i32, %arg1: i32, %arg2: i32, %arg3: memref<1x1x64x32xbf16, #tpu.memory_space<vmem>>, %arg4: memref<1x32x32xbf16, #tpu.memory_space<vmem>>, %arg5: memref<1x1x32xf32, #tpu.memory_space<vmem>>, %arg6: memref<1x1x32x64xbf16, #tpu.memory_space<vmem>>) attributes {dimension_semantics = [#tpu.dimension_semantics<parallel>, #tpu.dimension_semantics<parallel>, #tpu.dimension_semantics<parallel>], iteration_bounds = array<i64: 2, 2, 1>, scalar_prefetch = 0 : i64, scratch_operands = 0 : i64, tpu.core_type = #tpu.core_type<tc>, window_params = [{transform_indices = @transform_0, window_bounds = array<i64: 1, 1, 64, 32>}, {transform_indices = @transform_1, window_bounds = array<i64: 1, 32, 32>}, {transform_indices = @transform_2, window_bounds = array<i64: 1, 1, 32>}, {transform_indices = @transform_3, window_bounds = array<i64: 1, 1, 32, 64>}]} {
    %c0 = arith.constant 0 : index
    %c0_0 = arith.constant 0 : index
    %c0_1 = arith.constant 0 : index
    %c0_2 = arith.constant 0 : index
    %0 = vector.load %arg3[%c0, %c0_0, %c0_1, %c0_2] : memref<1x1x64x32xbf16, #tpu.memory_space<vmem>>, vector<1x1x64x32xbf16>
    %1 = vector.shape_cast %0 : vector<1x1x64x32xbf16> to vector<64x32xbf16>
    %c0_3 = arith.constant 0 : index
    %c0_4 = arith.constant 0 : index
    %c0_5 = arith.constant 0 : index
    %2 = vector.load %arg4[%c0_3, %c0_4, %c0_5] : memref<1x32x32xbf16, #tpu.memory_space<vmem>>, vector<1x32x32xbf16>
    %3 = vector.shape_cast %2 : vector<1x32x32xbf16> to vector<32x32xbf16>
    %cst = arith.constant dense<0.000000e+00> : vector<64x32xf32>
    %4 = tpu.matmul %1, %3, %cst {dimension_numbers = #tpu.dot_dimension_numbers<[1], [0], [0], [1], [0, 0, 1, 1], [], []>} : vector<64x32xbf16>, vector<32x32xbf16>, vector<64x32xf32> -> vector<64x32xf32>
    %c0_6 = arith.constant 0 : index
    %c0_7 = arith.constant 0 : index
    %c0_8 = arith.constant 0 : index
    %5 = vector.load %arg5[%c0_6, %c0_7, %c0_8] : memref<1x1x32xf32, #tpu.memory_space<vmem>>, vector<1x1x32xf32>
    %6 = vector.shape_cast %5 : vector<1x1x32xf32> to vector<1x32xf32>
    %7 = vector.broadcast %6 : vector<1x32xf32> to vector<64x32xf32>
    %8 = arith.addf %4, %7 : vector<64x32xf32>
    %cst_9 = arith.constant 0.000000e+00 : f32
    %9 = vector.broadcast %cst_9 : f32 to vector<64x32xf32>
    %10 = arith.maximumf %8, %9 : vector<64x32xf32>
    %11 = tpu.transpose %10, [1, 0] : vector<64x32xf32> -> vector<32x64xf32>
    %12 = arith.truncf %11 : vector<32x64xf32> to vector<32x64xbf16>
    %13 = vector.shape_cast %12 : vector<32x64xbf16> to vector<1x1x32x64xbf16>
    %c0_10 = arith.constant 0 : index
    %c0_11 = arith.constant 0 : index
    %c0_12 = arith.constant 0 : index
    %c0_13 = arith.constant 0 : index
    %14 = vector.load %arg6[%c0_10, %c0_11, %c0_12, %c0_13] : memref<1x1x32x64xbf16, #tpu.memory_space<vmem>>, vector<1x1x32x64xbf16>
    tpu.vector_store %arg6[%c0_10, %c0_11, %c0_12, %c0_13], %13 {strides = array<i32>} : memref<1x1x32x64xbf16, #tpu.memory_space<vmem>>, vector<1x1x32x64xbf16>,
    return
  }
  func.func @transform_0(%arg0: i32, %arg1: i32, %arg2: i32) -> (i32, i32, i32, i32) {
    %c0_i32 = arith.constant 0 : i32
    %c0_i32_0 = arith.constant 0 : i32
    return %arg0, %arg1, %arg2, %c0_i32 : i32, i32, i32, i32
  }
  func.func @transform_1(%arg0: i32, %arg1: i32, %arg2: i32) -> (i32, i32, i32) {
    %c0_i32 = arith.constant 0 : i32
    %c0_i32_0 = arith.constant 0 : i32
    %c0_i32_1 = arith.constant 0 : i32
    return %arg0, %c0_i32, %c0_i32_0 : i32, i32, i32
  }
  func.func @transform_2(%arg0: i32, %arg1: i32, %arg2: i32) -> (i32, i32, i32) {
    %c0_i32 = arith.constant 0 : i32
    %c0_i32_0 = arith.constant 0 : i32
    %c0_i32_1 = arith.constant 0 : i32
    return %arg0, %c0_i32, %c0_i32_0 : i32, i32, i32
  }
  func.func @transform_3(%arg0: i32, %arg1: i32, %arg2: i32) -> (i32, i32, i32, i32) {
    %c0_i32 = arith.constant 0 : i32
    %c0_i32_0 = arith.constant 0 : i32
    return %arg0, %arg1, %c0_i32, %arg2 : i32, i32, i32, i32
  }
}

module attributes {stable_mosaic.version = 11 : i64} {
  func.func @_conv2_gap_head_kernel(%arg0: i32, %arg1: i32, %arg2: memref<2x2x8x896xbf16, #tpu.memory_space<vmem>>, %arg3: memref<2x896x32xbf16, #tpu.memory_space<vmem>>, %arg4: memref<2x1x32xf32, #tpu.memory_space<vmem>>, %arg5: memref<32x128xf32, #tpu.memory_space<vmem>>, %arg6: memref<1x128xf32, #tpu.memory_space<vmem>>, %arg7: memref<128x2xf32, #tpu.memory_space<vmem>>, %arg8: memref<1x2xf32, #tpu.memory_space<vmem>>, %arg9: memref<64x128xf32, #tpu.memory_space<vmem>>, %arg10: memref<1x128xf32, #tpu.memory_space<vmem>>, %arg11: memref<128x2xf32, #tpu.memory_space<vmem>>, %arg12: memref<1x2xf32, #tpu.memory_space<vmem>>, %arg13: memref<2x2xf32, #tpu.memory_space<vmem>>, %arg14: memref<2x2xf32, #tpu.memory_space<vmem>>, %arg15: memref<2x2xf32, #tpu.memory_space<vmem>>, %arg16: memref<2x2x8x32xf32, #tpu.memory_space<vmem>>, %arg17: memref<2x2x32xf32, #tpu.memory_space<vmem>>) attributes {dimension_semantics = [#tpu.dimension_semantics<arbitrary>, #tpu.dimension_semantics<arbitrary>], iteration_bounds = array<i64: 1, 1>, scalar_prefetch = 0 : i64, scratch_operands = 2 : i64, tpu.core_type = #tpu.core_type<tc>, window_params = [{transform_indices = @transform_0, window_bounds = array<i64: 2, 2, 8, 896>}, {transform_indices = @transform_1, window_bounds = array<i64: 2, 896, 32>}, {pipeline_mode = #tpu.pipeline_mode<synchronous>, transform_indices = @transform_2, window_bounds = array<i64: 2, 1, 32>}, {pipeline_mode = #tpu.pipeline_mode<synchronous>, transform_indices = @transform_3, window_bounds = array<i64: 32, 128>}, {pipeline_mode = #tpu.pipeline_mode<synchronous>, transform_indices = @transform_4, window_bounds = array<i64: 1, 128>}, {pipeline_mode = #tpu.pipeline_mode<synchronous>, transform_indices = @transform_5, window_bounds = array<i64: 128, 2>}, {pipeline_mode = #tpu.pipeline_mode<synchronous>, transform_indices = @transform_6, window_bounds = array<i64: 1, 2>}, {pipeline_mode = #tpu.pipeline_mode<synchronous>, transform_indices = @transform_7, window_bounds = array<i64: 64, 128>}, {pipeline_mode = #tpu.pipeline_mode<synchronous>, transform_indices = @transform_8, window_bounds = array<i64: 1, 128>}, {pipeline_mode = #tpu.pipeline_mode<synchronous>, transform_indices = @transform_9, window_bounds = array<i64: 128, 2>}, {pipeline_mode = #tpu.pipeline_mode<synchronous>, transform_indices = @transform_10, window_bounds = array<i64: 1, 2>}, {pipeline_mode = #tpu.pipeline_mode<synchronous>, transform_indices = @transform_11, window_bounds = array<i64: 2, 2>}, {pipeline_mode = #tpu.pipeline_mode<synchronous>, transform_indices = @transform_12, window_bounds = array<i64: 2, 2>}, {pipeline_mode = #tpu.pipeline_mode<synchronous>, transform_indices = @transform_13, window_bounds = array<i64: 2, 2>}]} {
    %c0_i32 = arith.constant 0 : i32
    %0 = arith.cmpi eq, %arg0, %c0_i32 : i32
    %c0_i32_0 = arith.constant 0 : i32
    %1 = arith.cmpi eq, %arg1, %c0_i32_0 : i32
    %2 = arith.andi %0, %1 : i1
    %3 = arith.extui %2 : i1 to i32
    %c0_i32_1 = arith.constant 0 : i32
    %4 = arith.cmpi ne, %3, %c0_i32_1 : i32
    scf.if %4 {
      %cst_31 = arith.constant 0.000000e+00 : f32
      %44 = vector.broadcast %cst_31 : f32 to vector<2x2x32xf32>
      %c0_32 = arith.constant 0 : index
      %c0_33 = arith.constant 0 : index
      %c0_34 = arith.constant 0 : index
      %45 = vector.load %arg17[%c0_32, %c0_33, %c0_34] : memref<2x2x32xf32, #tpu.memory_space<vmem>>, vector<2x2x32xf32>
      tpu.vector_store %arg17[%c0_32, %c0_33, %c0_34], %44 {strides = array<i32>} : memref<2x2x32xf32, #tpu.memory_space<vmem>>, vector<2x2x32xf32>,
    } else {
    }
    %c0_i32_2 = arith.constant 0 : i32
    %5 = arith.cmpi eq, %arg1, %c0_i32_2 : i32
    %6 = arith.extui %5 : i1 to i32
    %c0_i32_3 = arith.constant 0 : i32
    %7 = arith.cmpi ne, %6, %c0_i32_3 : i32
    scf.if %7 {
      %cst_31 = arith.constant 0.000000e+00 : f32
      %44 = vector.broadcast %cst_31 : f32 to vector<2x2x8x32xf32>
      %c0_32 = arith.constant 0 : index
      %c0_33 = arith.constant 0 : index
      %c0_34 = arith.constant 0 : index
      %c0_35 = arith.constant 0 : index
      %45 = vector.load %arg16[%c0_32, %c0_33, %c0_34, %c0_35] : memref<2x2x8x32xf32, #tpu.memory_space<vmem>>, vector<2x2x8x32xf32>
      tpu.vector_store %arg16[%c0_32, %c0_33, %c0_34, %c0_35], %44 {strides = array<i32>} : memref<2x2x8x32xf32, #tpu.memory_space<vmem>>, vector<2x2x8x32xf32>,
    } else {
    }
    %c0 = arith.constant 0 : index
    %c0_4 = arith.constant 0 : index
    %c0_5 = arith.constant 0 : index
    %c0_6 = arith.constant 0 : index
    %8 = vector.load %arg2[%c0, %c0_4, %c0_5, %c0_6] : memref<2x2x8x896xbf16, #tpu.memory_space<vmem>>, vector<2x2x8x896xbf16>
    %c0_7 = arith.constant 0 : index
    %c0_8 = arith.constant 0 : index
    %c0_9 = arith.constant 0 : index
    %9 = vector.load %arg3[%c0_7, %c0_8, %c0_9] : memref<2x896x32xbf16, #tpu.memory_space<vmem>>, vector<2x896x32xbf16>
    %10 = vector.extract_strided_slice %8 {offsets = [0, 0, 0, 0], sizes = [1, 2, 8, 896], strides = [1, 1, 1, 1]} : vector<2x2x8x896xbf16> to vector<1x2x8x896xbf16>
    %11 = vector.shape_cast %10 : vector<1x2x8x896xbf16> to vector<2x8x896xbf16>
    %12 = vector.shape_cast %11 : vector<2x8x896xbf16> to vector<16x896xbf16>
    %13 = vector.extract_strided_slice %9 {offsets = [0, 0, 0], sizes = [1, 896, 32], strides = [1, 1, 1]} : vector<2x896x32xbf16> to vector<1x896x32xbf16>
    %14 = vector.shape_cast %13 : vector<1x896x32xbf16> to vector<896x32xbf16>
    %cst = arith.constant dense<0.000000e+00> : vector<16x32xf32>
    %15 = tpu.matmul %12, %14, %cst {dimension_numbers = #tpu.dot_dimension_numbers<[1], [0], [0], [1], [0, 0, 1, 1], [], []>} : vector<16x896xbf16>, vector<896x32xbf16>, vector<16x32xf32> -> vector<16x32xf32>
    %c0_10 = arith.constant 0 : index
    %c0_11 = arith.constant 0 : index
    %c0_12 = arith.constant 0 : index
    %c0_13 = arith.constant 0 : index
    %16 = vector.load %arg16[%c0_10, %c0_11, %c0_12, %c0_13] : memref<2x2x8x32xf32, #tpu.memory_space<vmem>>, vector<1x2x8x32xf32>
    %17 = vector.shape_cast %16 : vector<1x2x8x32xf32> to vector<2x8x32xf32>
    %18 = vector.shape_cast %15 : vector<16x32xf32> to vector<2x8x32xf32>
    %19 = arith.addf %17, %18 : vector<2x8x32xf32>
    %c0_14 = arith.constant 0 : index
    %c0_15 = arith.constant 0 : index
    %c0_16 = arith.constant 0 : index
    %c0_17 = arith.constant 0 : index
    %20 = vector.load %arg16[%c0_14, %c0_15, %c0_16, %c0_17] : memref<2x2x8x32xf32, #tpu.memory_space<vmem>>, vector<1x2x8x32xf32>
    %21 = vector.shape_cast %20 : vector<1x2x8x32xf32> to vector<2x8x32xf32>
    %22 = vector.shape_cast %19 : vector<2x8x32xf32> to vector<1x2x8x32xf32>
    tpu.vector_store %arg16[%c0_14, %c0_15, %c0_16, %c0_17], %22 {strides = array<i32>} : memref<2x2x8x32xf32, #tpu.memory_space<vmem>>, vector<1x2x8x32xf32>,
    %23 = vector.extract_strided_slice %8 {offsets = [1, 0, 0, 0], sizes = [1, 2, 8, 896], strides = [1, 1, 1, 1]} : vector<2x2x8x896xbf16> to vector<1x2x8x896xbf16>
    %24 = vector.shape_cast %23 : vector<1x2x8x896xbf16> to vector<2x8x896xbf16>
    %25 = vector.shape_cast %24 : vector<2x8x896xbf16> to vector<16x896xbf16>
    %26 = vector.extract_strided_slice %9 {offsets = [1, 0, 0], sizes = [1, 896, 32], strides = [1, 1, 1]} : vector<2x896x32xbf16> to vector<1x896x32xbf16>
    %27 = vector.shape_cast %26 : vector<1x896x32xbf16> to vector<896x32xbf16>
    %cst_18 = arith.constant dense<0.000000e+00> : vector<16x32xf32>
    %28 = tpu.matmul %25, %27, %cst_18 {dimension_numbers = #tpu.dot_dimension_numbers<[1], [0], [0], [1], [0, 0, 1, 1], [], []>} : vector<16x896xbf16>, vector<896x32xbf16>, vector<16x32xf32> -> vector<16x32xf32>
    %c1 = arith.constant 1 : index
    %c0_19 = arith.constant 0 : index
    %c0_20 = arith.constant 0 : index
    %c0_21 = arith.constant 0 : index
    %29 = vector.load %arg16[%c1, %c0_19, %c0_20, %c0_21] : memref<2x2x8x32xf32, #tpu.memory_space<vmem>>, vector<1x2x8x32xf32>
    %30 = vector.shape_cast %29 : vector<1x2x8x32xf32> to vector<2x8x32xf32>
    %31 = vector.shape_cast %28 : vector<16x32xf32> to vector<2x8x32xf32>
    %32 = arith.addf %30, %31 : vector<2x8x32xf32>
    %c1_22 = arith.constant 1 : index
    %c0_23 = arith.constant 0 : index
    %c0_24 = arith.constant 0 : index
    %c0_25 = arith.constant 0 : index
    %33 = vector.load %arg16[%c1_22, %c0_23, %c0_24, %c0_25] : memref<2x2x8x32xf32, #tpu.memory_space<vmem>>, vector<1x2x8x32xf32>
    %34 = vector.shape_cast %33 : vector<1x2x8x32xf32> to vector<2x8x32xf32>
    %35 = vector.shape_cast %32 : vector<2x8x32xf32> to vector<1x2x8x32xf32>
    tpu.vector_store %arg16[%c1_22, %c0_23, %c0_24, %c0_25], %35 {strides = array<i32>} : memref<2x2x8x32xf32, #tpu.memory_space<vmem>>, vector<1x2x8x32xf32>,
    %c0_i32_26 = arith.constant 0 : i32
    %36 = arith.cmpi eq, %arg1, %c0_i32_26 : i32
    %37 = arith.extui %36 : i1 to i32
    %c0_i32_27 = arith.constant 0 : i32
    %38 = arith.cmpi ne, %37, %c0_i32_27 : i32
    scf.if %38 {
      %c0_31 = arith.constant 0 : index
      %c0_32 = arith.constant 0 : index
      %c0_33 = arith.constant 0 : index
      %44 = vector.load %arg4[%c0_31, %c0_32, %c0_33] : memref<2x1x32xf32, #tpu.memory_space<vmem>>, vector<2x1x32xf32>
      %45 = vector.shape_cast %44 : vector<2x1x32xf32> to vector<2x1x1x32xf32>
      %c0_34 = arith.constant 0 : index
      %c0_35 = arith.constant 0 : index
      %c0_36 = arith.constant 0 : index
      %c0_37 = arith.constant 0 : index
      %46 = vector.load %arg16[%c0_34, %c0_35, %c0_36, %c0_37] : memref<2x2x8x32xf32, #tpu.memory_space<vmem>>, vector<2x2x8x32xf32>
      %47 = vector.broadcast %45 : vector<2x1x1x32xf32> to vector<2x2x8x32xf32>
      %48 = arith.addf %46, %47 : vector<2x2x8x32xf32>
      %cst_38 = arith.constant 0.000000e+00 : f32
      %49 = vector.broadcast %cst_38 : f32 to vector<2x2x8x32xf32>
      %50 = arith.maximumf %48, %49 : vector<2x2x8x32xf32>
      %c0_39 = arith.constant 0 : index
      %c0_40 = arith.constant 0 : index
      %c0_41 = arith.constant 0 : index
      %51 = vector.load %arg17[%c0_39, %c0_40, %c0_41] : memref<2x2x32xf32, #tpu.memory_space<vmem>>, vector<2x2x32xf32>
      %cst_42 = arith.constant dense<0.000000e+00> : vector<2x2x32xf32>
      %52 = vector.multi_reduction <add>, %50, %cst_42 [2] : vector<2x2x8x32xf32> to vector<2x2x32xf32>
      %53 = arith.addf %51, %52 : vector<2x2x32xf32>
      %c0_43 = arith.constant 0 : index
      %c0_44 = arith.constant 0 : index
      %c0_45 = arith.constant 0 : index
      %54 = vector.load %arg17[%c0_43, %c0_44, %c0_45] : memref<2x2x32xf32, #tpu.memory_space<vmem>>, vector<2x2x32xf32>
      tpu.vector_store %arg17[%c0_43, %c0_44, %c0_45], %53 {strides = array<i32>} : memref<2x2x32xf32, #tpu.memory_space<vmem>>, vector<2x2x32xf32>,
    } else {
    }
    %c0_i32_28 = arith.constant 0 : i32
    %39 = arith.cmpi eq, %arg0, %c0_i32_28 : i32
    %c0_i32_29 = arith.constant 0 : i32
    %40 = arith.cmpi eq, %arg1, %c0_i32_29 : i32
    %41 = arith.andi %39, %40 : i1
    %42 = arith.extui %41 : i1 to i32
    %c0_i32_30 = arith.constant 0 : i32
    %43 = arith.cmpi ne, %42, %c0_i32_30 : i32
    scf.if %43 {
      %c0_31 = arith.constant 0 : index
      %c0_32 = arith.constant 0 : index
      %c0_33 = arith.constant 0 : index
      %44 = vector.load %arg17[%c0_31, %c0_32, %c0_33] : memref<2x2x32xf32, #tpu.memory_space<vmem>>, vector<2x2x32xf32>
      %cst_34 = arith.constant 1.250000e-01 : f32
      %45 = vector.broadcast %cst_34 : f32 to vector<2x2x32xf32>
      %46 = arith.mulf %44, %45 : vector<2x2x32xf32>
      %47 = vector.extract_strided_slice %46 {offsets = [0, 0, 0], sizes = [1, 2, 32], strides = [1, 1, 1]} : vector<2x2x32xf32> to vector<1x2x32xf32>
      %48 = vector.shape_cast %47 : vector<1x2x32xf32> to vector<2x32xf32>
      %49 = vector.extract_strided_slice %46 {offsets = [1, 0, 0], sizes = [1, 2, 32], strides = [1, 1, 1]} : vector<2x2x32xf32> to vector<1x2x32xf32>
      %50 = vector.shape_cast %49 : vector<1x2x32xf32> to vector<2x32xf32>
      %c0_35 = arith.constant 0 : index
      %c0_36 = arith.constant 0 : index
      %51 = vector.load %arg5[%c0_35, %c0_36] : memref<32x128xf32, #tpu.memory_space<vmem>>, vector<32x128xf32>
      %c0_37 = arith.constant 0 : index
      %c0_38 = arith.constant 0 : index
      %52 = vector.load %arg6[%c0_37, %c0_38] : memref<1x128xf32, #tpu.memory_space<vmem>>, vector<1x128xf32>
      %c0_39 = arith.constant 0 : index
      %c0_40 = arith.constant 0 : index
      %53 = vector.load %arg7[%c0_39, %c0_40] : memref<128x2xf32, #tpu.memory_space<vmem>>, vector<128x2xf32>
      %c0_41 = arith.constant 0 : index
      %c0_42 = arith.constant 0 : index
      %54 = vector.load %arg8[%c0_41, %c0_42] : memref<1x2xf32, #tpu.memory_space<vmem>>, vector<1x2xf32>
      %cst_43 = arith.constant dense<0.000000e+00> : vector<2x128xf32>
      %55 = tpu.matmul %48, %51, %cst_43 {dimension_numbers = #tpu.dot_dimension_numbers<[1], [0], [0], [1], [0, 0, 1, 1], [], []>} : vector<2x32xf32>, vector<32x128xf32>, vector<2x128xf32> -> vector<2x128xf32>
      %56 = vector.broadcast %52 : vector<1x128xf32> to vector<2x128xf32>
      %57 = arith.addf %55, %56 : vector<2x128xf32>
      %cst_44 = arith.constant 0.000000e+00 : f32
      %58 = vector.broadcast %cst_44 : f32 to vector<2x128xf32>
      %59 = arith.maximumf %57, %58 : vector<2x128xf32>
      %cst_45 = arith.constant dense<0.000000e+00> : vector<2x128xf32>
      %60 = tpu.matmul %50, %51, %cst_45 {dimension_numbers = #tpu.dot_dimension_numbers<[1], [0], [0], [1], [0, 0, 1, 1], [], []>} : vector<2x32xf32>, vector<32x128xf32>, vector<2x128xf32> -> vector<2x128xf32>
      %61 = vector.broadcast %52 : vector<1x128xf32> to vector<2x128xf32>
      %62 = arith.addf %60, %61 : vector<2x128xf32>
      %cst_46 = arith.constant 0.000000e+00 : f32
      %63 = vector.broadcast %cst_46 : f32 to vector<2x128xf32>
      %64 = arith.maximumf %62, %63 : vector<2x128xf32>
      %cst_47 = arith.constant dense<0.000000e+00> : vector<2x2xf32>
      %65 = tpu.matmul %59, %53, %cst_47 {dimension_numbers = #tpu.dot_dimension_numbers<[1], [0], [0], [1], [0, 0, 1, 1], [], []>} : vector<2x128xf32>, vector<128x2xf32>, vector<2x2xf32> -> vector<2x2xf32>
      %66 = vector.broadcast %54 : vector<1x2xf32> to vector<2x2xf32>
      %67 = arith.addf %65, %66 : vector<2x2xf32>
      %c0_48 = arith.constant 0 : index
      %c0_49 = arith.constant 0 : index
      %68 = vector.load %arg14[%c0_48, %c0_49] : memref<2x2xf32, #tpu.memory_space<vmem>>, vector<2x2xf32>
      tpu.vector_store %arg14[%c0_48, %c0_49], %67 {strides = array<i32>} : memref<2x2xf32, #tpu.memory_space<vmem>>, vector<2x2xf32>,
      %cst_50 = arith.constant dense<0.000000e+00> : vector<2x2xf32>
      %69 = tpu.matmul %64, %53, %cst_50 {dimension_numbers = #tpu.dot_dimension_numbers<[1], [0], [0], [1], [0, 0, 1, 1], [], []>} : vector<2x128xf32>, vector<128x2xf32>, vector<2x2xf32> -> vector<2x2xf32>
      %70 = vector.broadcast %54 : vector<1x2xf32> to vector<2x2xf32>
      %71 = arith.addf %69, %70 : vector<2x2xf32>
      %c0_51 = arith.constant 0 : index
      %c0_52 = arith.constant 0 : index
      %72 = vector.load %arg15[%c0_51, %c0_52] : memref<2x2xf32, #tpu.memory_space<vmem>>, vector<2x2xf32>
      tpu.vector_store %arg15[%c0_51, %c0_52], %71 {strides = array<i32>} : memref<2x2xf32, #tpu.memory_space<vmem>>, vector<2x2xf32>,
      %c0_53 = arith.constant 0 : index
      %c0_54 = arith.constant 0 : index
      %73 = vector.load %arg9[%c0_53, %c0_54] : memref<64x128xf32, #tpu.memory_space<vmem>>, vector<64x128xf32>
      %74 = vector.extract_strided_slice %73 {offsets = [0, 0], sizes = [32, 128], strides = [1, 1]} : vector<64x128xf32> to vector<32x128xf32>
      %cst_55 = arith.constant dense<0.000000e+00> : vector<2x128xf32>
      %75 = tpu.matmul %48, %74, %cst_55 {dimension_numbers = #tpu.dot_dimension_numbers<[1], [0], [0], [1], [0, 0, 1, 1], [], []>} : vector<2x32xf32>, vector<32x128xf32>, vector<2x128xf32> -> vector<2x128xf32>
      %76 = vector.extract_strided_slice %73 {offsets = [32, 0], sizes = [32, 128], strides = [1, 1]} : vector<64x128xf32> to vector<32x128xf32>
      %cst_56 = arith.constant dense<0.000000e+00> : vector<2x128xf32>
      %77 = tpu.matmul %50, %76, %cst_56 {dimension_numbers = #tpu.dot_dimension_numbers<[1], [0], [0], [1], [0, 0, 1, 1], [], []>} : vector<2x32xf32>, vector<32x128xf32>, vector<2x128xf32> -> vector<2x128xf32>
      %78 = arith.addf %75, %77 : vector<2x128xf32>
      %c0_57 = arith.constant 0 : index
      %c0_58 = arith.constant 0 : index
      %79 = vector.load %arg10[%c0_57, %c0_58] : memref<1x128xf32, #tpu.memory_space<vmem>>, vector<1x128xf32>
      %80 = vector.broadcast %79 : vector<1x128xf32> to vector<2x128xf32>
      %81 = arith.addf %78, %80 : vector<2x128xf32>
      %cst_59 = arith.constant 0.000000e+00 : f32
      %82 = vector.broadcast %cst_59 : f32 to vector<2x128xf32>
      %83 = arith.maximumf %81, %82 : vector<2x128xf32>
      %c0_60 = arith.constant 0 : index
      %c0_61 = arith.constant 0 : index
      %84 = vector.load %arg11[%c0_60, %c0_61] : memref<128x2xf32, #tpu.memory_space<vmem>>, vector<128x2xf32>
      %cst_62 = arith.constant dense<0.000000e+00> : vector<2x2xf32>
      %85 = tpu.matmul %83, %84, %cst_62 {dimension_numbers = #tpu.dot_dimension_numbers<[1], [0], [0], [1], [0, 0, 1, 1], [], []>} : vector<2x128xf32>, vector<128x2xf32>, vector<2x2xf32> -> vector<2x2xf32>
      %c0_63 = arith.constant 0 : index
      %c0_64 = arith.constant 0 : index
      %86 = vector.load %arg12[%c0_63, %c0_64] : memref<1x2xf32, #tpu.memory_space<vmem>>, vector<1x2xf32>
      %87 = vector.broadcast %86 : vector<1x2xf32> to vector<2x2xf32>
      %88 = arith.addf %85, %87 : vector<2x2xf32>
      %c0_65 = arith.constant 0 : index
      %c0_66 = arith.constant 0 : index
      %89 = vector.load %arg13[%c0_65, %c0_66] : memref<2x2xf32, #tpu.memory_space<vmem>>, vector<2x2xf32>
      tpu.vector_store %arg13[%c0_65, %c0_66], %88 {strides = array<i32>} : memref<2x2xf32, #tpu.memory_space<vmem>>, vector<2x2xf32>,
    } else {
    }
    return
  }
  func.func @transform_0(%arg0: i32, %arg1: i32) -> (i32, i32, i32, i32) {
    %c0_i32 = arith.constant 0 : i32
    %c0_i32_0 = arith.constant 0 : i32
    %c0_i32_1 = arith.constant 0 : i32
    return %c0_i32, %c0_i32_0, %arg0, %arg1 : i32, i32, i32, i32
  }
  func.func @transform_1(%arg0: i32, %arg1: i32) -> (i32, i32, i32) {
    %c0_i32 = arith.constant 0 : i32
    %c0_i32_0 = arith.constant 0 : i32
    %c0_i32_1 = arith.constant 0 : i32
    return %c0_i32, %arg1, %c0_i32_0 : i32, i32, i32
  }
  func.func @transform_2(%arg0: i32, %arg1: i32) -> (i32, i32, i32) {
    %c0_i32 = arith.constant 0 : i32
    %c0_i32_0 = arith.constant 0 : i32
    %c0_i32_1 = arith.constant 0 : i32
    %c0_i32_2 = arith.constant 0 : i32
    return %c0_i32, %c0_i32_0, %c0_i32_1 : i32, i32, i32
  }
  func.func @transform_3(%arg0: i32, %arg1: i32) -> (i32, i32) {
    %c0_i32 = arith.constant 0 : i32
    %c0_i32_0 = arith.constant 0 : i32
    %c0_i32_1 = arith.constant 0 : i32
    return %c0_i32, %c0_i32_0 : i32, i32
  }
  func.func @transform_4(%arg0: i32, %arg1: i32) -> (i32, i32) {
    %c0_i32 = arith.constant 0 : i32
    %c0_i32_0 = arith.constant 0 : i32
    %c0_i32_1 = arith.constant 0 : i32
    return %c0_i32, %c0_i32_0 : i32, i32
  }
  func.func @transform_5(%arg0: i32, %arg1: i32) -> (i32, i32) {
    %c0_i32 = arith.constant 0 : i32
    %c0_i32_0 = arith.constant 0 : i32
    %c0_i32_1 = arith.constant 0 : i32
    return %c0_i32, %c0_i32_0 : i32, i32
  }
  func.func @transform_6(%arg0: i32, %arg1: i32) -> (i32, i32) {
    %c0_i32 = arith.constant 0 : i32
    %c0_i32_0 = arith.constant 0 : i32
    %c0_i32_1 = arith.constant 0 : i32
    return %c0_i32, %c0_i32_0 : i32, i32
  }
  func.func @transform_7(%arg0: i32, %arg1: i32) -> (i32, i32) {
    %c0_i32 = arith.constant 0 : i32
    %c0_i32_0 = arith.constant 0 : i32
    %c0_i32_1 = arith.constant 0 : i32
    return %c0_i32, %c0_i32_0 : i32, i32
  }
  func.func @transform_8(%arg0: i32, %arg1: i32) -> (i32, i32) {
    %c0_i32 = arith.constant 0 : i32
    %c0_i32_0 = arith.constant 0 : i32
    %c0_i32_1 = arith.constant 0 : i32
    return %c0_i32, %c0_i32_0 : i32, i32
  }
  func.func @transform_9(%arg0: i32, %arg1: i32) -> (i32, i32) {
    %c0_i32 = arith.constant 0 : i32
    %c0_i32_0 = arith.constant 0 : i32
    %c0_i32_1 = arith.constant 0 : i32
    return %c0_i32, %c0_i32_0 : i32, i32
  }
  func.func @transform_10(%arg0: i32, %arg1: i32) -> (i32, i32) {
    %c0_i32 = arith.constant 0 : i32
    %c0_i32_0 = arith.constant 0 : i32
    %c0_i32_1 = arith.constant 0 : i32
    return %c0_i32, %c0_i32_0 : i32, i32
  }
  func.func @transform_11(%arg0: i32, %arg1: i32) -> (i32, i32) {
    %c0_i32 = arith.constant 0 : i32
    %c0_i32_0 = arith.constant 0 : i32
    %c0_i32_1 = arith.constant 0 : i32
    return %c0_i32, %c0_i32_0 : i32, i32
  }
  func.func @transform_12(%arg0: i32, %arg1: i32) -> (i32, i32) {
    %c0_i32 = arith.constant 0 : i32
    %c0_i32_0 = arith.constant 0 : i32
    %c0_i32_1 = arith.constant 0 : i32
    return %c0_i32, %c0_i32_0 : i32, i32
  }
  func.func @transform_13(%arg0: i32, %arg1: i32) -> (i32, i32) {
    %c0_i32 = arith.constant 0 : i32
    %c0_i32_0 = arith.constant 0 : i32
    %c0_i32_1 = arith.constant 0 : i32
    return %c0_i32, %c0_i32_0 : i32, i32
  }
}

</mosaic_0001>

<bundles_post_ra>
// kernel: model_cnn_ad_forward.2
= control target key start
LH: loop header
LB: loop body
LE: loop exit
PB: predicated region body
PF: predicated region fallthrough
CT: control target
= control target key end

     0   :  { %s759_s12 = smov 0   ;;  %s761_s13 = smov 0   ;;  %s825_s0 = inlined_call_operand.vmem [shape: bf16[2,2,64,32], index: 0, kind: input, shape index: {}]   ;;  %s826_s1 = inlined_call_operand.vmem [shape: bf16[2,32,32], index: 1, kind: input, shape index: {}]   ;;  %s827_s2 = inlined_call_operand.vmem [shape: f32[2,1,32], index: 2, kind: input, shape index: {}]   ;;  %s828_s3 = inlined_call_operand.vmem [shape: bf16[2,2,32,64], index: 3, kind: output, shape index: {}]  }
   0x1   :  { %s763_s14 = smov 0   ;;  %s765_s15 = smov 0  }
   0x2   :  { %s767_s16 = smov 0  }
   0x3 LB: > { %s28_s17 = sadd.s32 1, %s729_s14  ;;  %s32_s18 = sadd.s32 1, %s733_s15  ;;  %s737_s16 = sphi %s767_s16, %s13_s16   ;;  %s733_s15 = sphi %s765_s15, %s832_s15   ;;  %s729_s14 = sphi %s763_s14, %s831_s14   ;;  %s725_s13 = sphi %s761_s13, %s830_s13   ;;  %s721_s12 = sphi %s759_s12, %s829_s12  }
   0x4   : > { %p30_p0 = scmp.ge.s32.totalorder %s28_s17, 2  ;;  %p599_p1 = scmp.ge.s32.totalorder %s737_s16, 1 }
   0x5   : > { %p191_p2 = scmp.lt.s32.totalorder %s737_s16, 5 }
   0x6   : > { %s834_s17 = smov (%p30_p0, %s28_s17), 0  ;;  %s836_s18 = smov (!%p30_p0, %s32_s18), %s733_s15 }
   0x7   : > { %p192_p3 = pnand %p599_p1, %p191_p2  ;;  %p34_p4 = scmp.ge.s32.totalorder %s836_s18, 2 }
   0x8   : > { %p239_p5 = scmp.lt.s32.totalorder (!%p192_p3), %s725_s13, 1  ;;  %p241_p6 = scmp.lt.s32.totalorder (!%p192_p3), %s721_s12, 1  ;;  %vm324_vm0 = vcmask (!%p192_p3), 261120   ;;  %vm458_vm1 = vcmask (!%p192_p3), 519168  }
   0x9   : > { %s838_s18 = smov (%p34_p4, %s836_s18), 0  ;;  %195 = sbr.rel (%p192_p3) target bundleno = 389 (0x185), region = 32 }
  0x10   : > { %s840_s13 = smov (!%p239_p5, %s725_s13), 1  ;;  %s842_s12 = smov (!%p241_p6, %s721_s12), 1 }
  0x11   : > { %s601_s19 = sshll.u32 %s840_s13, 4  ;;  %s600_s20 = sshll.u32 %s842_s12, 3 }
  0x12   : > { %s256_s23 = scalar_lea.vmem %s826_s1, %s601_s19  ;;  %s248_s24 = sadd.s32 %s601_s19, %s600_s20 }
  0x13   : > { %v693_v0 = vld [vmem:[%s256_s23] sm:$0xff]   ;;  %s602_s25 = sshll.u32 %s248_s24, 2  ;;  %v694_v1 = vld [vmem:[%s256_s23 + $0x8] sm:$0xff]   ;;  %s259_s4 = scalar_lea.vmem %s827_s2, %s840_s13 }
  0x14   : > { %s250_s28 = scalar_lea.vmem %s825_s0, %s602_s25  ;;  %636 = vmatprep.subr.bf16.mxu0 %v693_v0  ;;  %648 = vmatprep.subr.bf16.mxu1 %v693_v0  ;;  %v608_v6 = vld [vmem:[%s259_s4] ss:$0 sm:$0xff]  ;;  %s605_s5 = sshll.u32 %s842_s12, 2 }
  0x15   : > { %637 = vmatpush3.bf16.msra.mxu0 %v693_v0  ;;  %v695_v2 = vld [vmem:[%s250_s28] sm:$0xff]   ;;  %650 = vmatpush3.bf16.msra.mxu1 %v693_v0  ;;  %v696_v3 = vld [vmem:[%s250_s28 + $0x8] sm:$0xff]   ;;  %v697_v4 = vld [vmem:[%s250_s28 + $0x10] sm:$0xff]   ;;  %s606_s6 = sshll.u32 %s840_s13, 3 }
  0x16   : > { %638 = vmatprep.subr.bf16.mxu0 %v694_v1  ;;  %649 = vmatprep.subr.bf16.mxu1 %v694_v1  ;;  %v698_v5 = vld [vmem:[%s250_s28 + $0x18] sm:$0xff]   ;;  %s269_s7 = sadd.s32 %s606_s6, %s605_s5 }
  0x17   : > { %640 = vmatprep.mubr.msk.bf16.mxu0 %vm324_vm0, %v695_v2  ;;  %644 = vmatprep.mubr.msk.bf16.mxu1 %vm324_vm0, %v697_v4  ;;  %s607_s8 = sshll.u32 %s269_s7, 2 }
  0x18   : > { %s271_s11 = scalar_lea.vmem %s828_s3, %s607_s8 }
  0x19   : > { %639 = vmatpush3.bf16.msra.mxu0 %v694_v1  ;;  %651 = vmatpush3.bf16.msra.mxu1 %v694_v1 }
  0x1c   : > { %641 = vmatmul.mubr.msk.bf16.vlgmr.msra.gmra.mrb[0].mxu0 %vm324_vm0, %v696_v3  ;;  %645 = vmatmul.mubr.msk.bf16.vlgmr.msra.gmra.mrb[0].mxu1 %vm324_vm0, %v698_v5 }
  0xef   : > { %v642_v7 = vpop.f32.mrb[0].mxu0  ;;  %v646_v8 = vpop.f32.mrb[0].mxu1 }
  0xf0   : > { %v371_v9 = vpop.f32.mrb[1].mxu0  ;;  %v387_v10 = vpop.f32.mrb[1].mxu1  ;;  %v380_v18 = vadd.f32 %v642_v7, %v608_v6  ;;  %v396_v26 = vadd.f32 %v646_v8, %v608_v6 }
  0xf1   : > { %v643_v11 = vpop.f32.mrb[2].mxu0  ;;  %v372_v12 = vadd.f32 %v608_v6, %v371_v9  ;;  %v647_v13 = vpop.f32.mrb[2].mxu1  ;;  %v388_v22 = vadd.f32 %v608_v6, %v387_v10 }
  0xf2   : > { %v374_v14 = vpop.f32.mrb[3].mxu0  ;;  %v390_v15 = vpop.f32.mrb[3].mxu1  ;;  %v404_v20 = vmax.f32 %v380_v18, 0.0  ;;  %v383_v21 = vadd.f32 %v643_v11, %v608_v6  ;;  %v408_v28 = vmax.f32 %v396_v26, 0.0  ;;  %v399_v29 = vadd.f32 %v647_v13, %v608_v6 }
  0xf3   : > { %v375_v16 = vadd.f32 %v608_v6, %v374_v14  ;;  %v402_v17 = vmax.f32 %v372_v12, 0.0  ;;  %v406_v24 = vmax.f32 %v388_v22, 0.0  ;;  %v391_v25 = vadd.f32 %v608_v6, %v390_v15 }
  0xf4   : > { %v405_v23 = vmax.f32 %v383_v21, 0.0  ;;  %v409_v30 = vmax.f32 %v399_v29, 0.0 }
  0xf5   : > { %410 = vxpose.xlu0.b32.start [1/8] (short) (narrow) %v402_v17, 32  ;;  %v403_v19 = vmax.f32 %v375_v16, 0.0  ;;  %v407_v27 = vmax.f32 %v391_v25, 0.0 }
  0xf9   : > { %411 = vxpose.xlu0.b32.cont [2/8] (short) (narrow) %v403_v19, 32 }
  0xfd   : > { %412 = vxpose.xlu0.b32.cont [3/8] (short) (narrow) %v404_v20, 32 }
 0x101   : > { %413 = vxpose.xlu0.b32.cont [4/8] (short) (narrow) %v405_v23, 32 }
 0x105   : > { %414 = vxpose.xlu0.b32.cont [5/8] (short) (narrow) %v406_v24, 32 }
 0x109   : > { %415 = vxpose.xlu0.b32.cont [6/8] (short) (narrow) %v407_v27, 32 }
 0x10d   : > { %416 = vxpose.xlu0.b32.cont [7/8] (short) (narrow) %v408_v28, 32 }
 0x111   : > { %417 = vxpose.xlu0.b32.end [8/8] (short) (narrow) %v409_v30, 32 }
 0x175   : > { %v426_v31 = vpop.trf.xlu0 }
 0x176   : > { %v626_v32 = vpack.c.bf16 %v426_v31, %v426_v31 }
 0x178   : > { %459 = vst.msk [vmem:[%s271_s11] sm:$0xf] %vm458_vm1, %v626_v32 }
 0x179   : > { %v427_v33 = vpop.trf.xlu0 }
 0x17a   : > { %v627_v34 = vpack.c.bf16 %v427_v33, %v427_v33 }
 0x17c   : > { %460 = vst.msk [vmem:[%s271_s11 + $0x4] sm:$0xf] %vm458_vm1, %v627_v34 }
 0x17d   : > { %v428_v35 = vpop.trf.xlu0 }
 0x17e   : > { %v628_v36 = vpack.c.bf16 %v428_v35, %v428_v35 }
 0x180   : > { %461 = vst.msk [vmem:[%s271_s11 + $0x8] sm:$0xf] %vm458_vm1, %v628_v36 }
 0x181   : > { %v429_v37 = vpop.trf.xlu0 }
 0x182   : > { %v629_v38 = vpack.c.bf16 %v429_v37, %v429_v37 }
 0x184   : > { %462 = vst.msk [vmem:[%s271_s11 + $0xc] sm:$0xf] %vm458_vm1, %v629_v38 }
 0x185 PF: > { %s13_s16 = sadd.s32 1, %s737_s16   ;;  %s829_s12 = smov %s729_s14 }
 0x186   : > { %p10_p7 = scmp.ge.s32.totalorder %s13_s16, 6   ;;  %s830_s13 = smov %s733_s15 }
 0x187   : > { %s831_s14 = smov %s834_s17  ;;  %s832_s15 = smov %s838_s18 }
 0x188   :  { %12 = sbr.rel (!%p10_p7) target bundleno = 3 (0x3), region = 68 }

// kernel: model_cnn_ad_forward.3
= control target key start
LH: loop header
LB: loop body
LE: loop exit
PB: predicated region body
PF: predicated region fallthrough
CT: control target
= control target key end

     0   :  { %19 = vsyncpa [#allocation5], 0  ;;  %v2933_v36 = vmov 0.0   ;;  %vm2934_vm0 = vmmov 0   ;;  %s3710_s0 = inlined_call_operand.vmem [shape: bf16[2,2,8,896], index: 0, kind: input, shape index: {}]   ;;  %s3711_s1 = inlined_call_operand.vmem [shape: bf16[2,896,32], index: 1, kind: input, shape index: {}]   ;;  %s3712_s2 = inlined_call_operand.vmem [shape: f32[2,1,32], index: 2, kind: input, shape index: {}]   ;;  %s3713_s3 = inlined_call_operand.vmem [shape: f32[32,128], index: 3, kind: input, shape index: {}]   ;;  %s3714_s4 = inlined_call_operand.vmem [shape: f32[1,128], index: 4, kind: input, shape index: {}]   ;;  %s3715_s5 = inlined_call_operand.vmem [shape: f32[128,2], index: 5, kind: input, shape index: {}]   ;;  %s3716_s6 = inlined_call_operand.vmem [shape: f32[1,2], index: 6, kind: input, shape index: {}]   ;;  %s3717_s7 = inlined_call_operand.vmem [shape: f32[64,128], index: 7, kind: input, shape index: {}]   ;;  %s3718_s8 = inlined_call_operand.vmem [shape: f32[1,128], index: 8, kind: input, shape index: {}]   ;;  %s3719_s9 = inlined_call_operand.vmem [shape: f32[128,2], index: 9, kind: input, shape index: {}]   ;;  %s3720_s10 = inlined_call_operand.vmem [shape: f32[1,2], index: 10, kind: input, shape index: {}]   ;;  %s3721_s11 = inlined_call_operand.hbm [shape: f32[2,2], index: 11, kind: output, shape index: {0}]   ;;  %s3722_s12 = inlined_call_operand.hbm [shape: f32[2,2], index: 12, kind: output, shape index: {1}]   ;;  %s3723_s13 = inlined_call_operand.hbm [shape: f32[2,2], index: 13, kind: output, shape index: {2}]  }
   0x1   :  { %v2731_v0 = vld [vmem:[%s3711_s1 + $0x40] sm:$0xff]   ;;  %v2735_v4 = vld [vmem:[%s3711_s1 + $0x48] sm:$0xff]   ;;  %v2739_v8 = vld [vmem:[%s3711_s1 + $0x50] sm:$0xff]  }
   0x2   :  { %v2732_v1 = vld [vmem:[%s3711_s1 + $0xc0] sm:$0xff]   ;;  %2219 = vmatprep.subr.bf16.mxu0 %v2731_v0  ;;  %v2736_v5 = vld [vmem:[%s3711_s1 + $0xc8] sm:$0xff]   ;;  %v2740_v9 = vld [vmem:[%s3711_s1 + $0xd0] sm:$0xff]  }
   0x3   :  { %v2733_v2 = vld [vmem:[%s3711_s1] sm:$0xff]   ;;  %2241 = vmatprep.subr.bf16.mxu1 %v2732_v1  ;;  %v2737_v6 = vld [vmem:[%s3711_s1 + $0x8] sm:$0xff]   ;;  %v2741_v10 = vld [vmem:[%s3711_s1 + $0x10] sm:$0xff]  }
   0x4   :  { %v2734_v3 = vld [vmem:[%s3711_s1 + $0x80] sm:$0xff]   ;;  %2220 = vmatpush3.bf16.msra.mxu0 %v2733_v2  ;;  %v2738_v7 = vld [vmem:[%s3711_s1 + $0x88] sm:$0xff]   ;;  %v2742_v11 = vld [vmem:[%s3711_s1 + $0x90] sm:$0xff]  }
   0x5   :  { %2242 = vmatpush3.bf16.msra.mxu1 %v2734_v3  ;;  %2221 = vmatprep.subr.bf16.mxu0 %v2735_v4  ;;  %v2743_v12 = vld [vmem:[%s3711_s1 + $0x58] sm:$0xff]   ;;  %v2747_v16 = vld [vmem:[%s3711_s1 + $0x60] sm:$0xff]   ;;  %v2751_v20 = vld [vmem:[%s3711_s1 + $0x68] sm:$0xff]  }
   0x6   :  { %2243 = vmatprep.subr.bf16.mxu1 %v2736_v5  ;;  %v2744_v13 = vld [vmem:[%s3711_s1 + $0xd8] sm:$0xff]   ;;  %v2748_v17 = vld [vmem:[%s3711_s1 + $0xe0] sm:$0xff]   ;;  %v2752_v21 = vld [vmem:[%s3711_s1 + $0xe8] sm:$0xff]  }
   0x7   :  { %v2745_v14 = vld [vmem:[%s3711_s1 + $0x18] sm:$0xff]   ;;  %v2749_v18 = vld [vmem:[%s3711_s1 + $0x20] sm:$0xff]   ;;  %v2753_v22 = vld [vmem:[%s3711_s1 + $0x28] sm:$0xff]  }
   0x8   :  { %2222 = vmatpush3.bf16.msra.mxu0 %v2737_v6  ;;  %v2746_v15 = vld [vmem:[%s3711_s1 + $0x98] sm:$0xff]   ;;  %v2750_v19 = vld [vmem:[%s3711_s1 + $0xa0] sm:$0xff]   ;;  %v2754_v23 = vld [vmem:[%s3711_s1 + $0xa8] sm:$0xff]  }
   0x9   :  { %2244 = vmatpush3.bf16.msra.mxu1 %v2738_v7  ;;  %2223 = vmatprep.subr.bf16.mxu0 %v2739_v8  ;;  %v2755_v24 = vld [vmem:[%s3711_s1 + $0x70] sm:$0xff]   ;;  %v2759_v28 = vld [vmem:[%s3711_s1 + $0x78] sm:$0xff]   ;;  %v2765_v33 = vld [vmem:[%s3710_s0 + $0x4] ss:$28 sps:$4 sm:$0xff]  }
   0xa   :  { %2245 = vmatprep.subr.bf16.mxu1 %v2740_v9  ;;  %v2756_v25 = vld [vmem:[%s3711_s1 + $0xf0] sm:$0xff]   ;;  %v2760_v29 = vld [vmem:[%s3711_s1 + $0xf8] sm:$0xff]   ;;  %v2766_v34 = vld [vmem:[%s3710_s0 + $0x8] ss:$28 sps:$4 sm:$0xff]   ;;  %705 = vmatprep.mubr.bf16.mxu0 %v2765_v33 }
   0xb   :  { %v2757_v26 = vld [vmem:[%s3711_s1 + $0x30] sm:$0xff]   ;;  %v2761_v30 = vld [vmem:[%s3711_s1 + $0x38] sm:$0xff]   ;;  %v2768_v35 = vld [vmem:[%s3710_s0 + $0xc] ss:$28 sps:$4 sm:$0xff]  }
   0xc   :  { %2224 = vmatpush3.bf16.msra.mxu0 %v2741_v10  ;;  %v2758_v27 = vld [vmem:[%s3711_s1 + $0xb0] sm:$0xff]   ;;  %v2762_v31 = vld [vmem:[%s3711_s1 + $0xb8] sm:$0xff]   ;;  %v2769_v37 = vld [vmem:[%s3711_s1 + $0x140] sm:$0xff]   ;;  %746 = vmatprep.mubr.bf16.mxu1 %v2768_v35 }
   0xd   :  { %2246 = vmatpush3.bf16.msra.mxu1 %v2742_v11  ;;  %2225 = vmatprep.subr.bf16.mxu0 %v2743_v12  ;;  %v2763_v32 = vld [vmem:[%s3710_s0] ss:$28 sps:$4 sm:$0xff]   ;;  %v2772_v40 = vld [vmem:[%s3711_s1 + $0x148] sm:$0xff]   ;;  %v2775_v43 = vld [vmem:[%s3711_s1 + $0x150] sm:$0xff]  }
   0xe   :  { %2247 = vmatprep.subr.bf16.mxu1 %v2744_v13  ;;  %v2770_v38 = vld [vmem:[%s3711_s1 + $0x100] sm:$0xff]   ;;  %v2773_v41 = vld [vmem:[%s3711_s1 + $0x108] sm:$0xff]   ;;  %v2776_v44 = vld [vmem:[%s3711_s1 + $0x110] sm:$0xff]  }
   0xf   :  { %v2771_v39 = vld [vmem:[%s3711_s1 + $0x180] sm:$0xff]   ;;  %v2774_v42 = vld [vmem:[%s3711_s1 + $0x188] sm:$0xff]   ;;  %v2777_v45 = vld [vmem:[%s3711_s1 + $0x190] sm:$0xff]  }
  0x10   :  { %2226 = vmatpush3.bf16.msra.mxu0 %v2745_v14  ;;  %v2778_v46 = vld [vmem:[%s3711_s1 + $0x158] sm:$0xff]   ;;  %v2781_v49 = vld [vmem:[%s3711_s1 + $0x160] sm:$0xff]   ;;  %v2784_v52 = vld [vmem:[%s3711_s1 + $0x168] sm:$0xff]  }
  0x11   :  { %2248 = vmatpush3.bf16.msra.mxu1 %v2746_v15  ;;  %2227 = vmatprep.subr.bf16.mxu0 %v2747_v16  ;;  %v2779_v47 = vld [vmem:[%s3711_s1 + $0x118] sm:$0xff]   ;;  %v2782_v50 = vld [vmem:[%s3711_s1 + $0x120] sm:$0xff]   ;;  %v2785_v53 = vld [vmem:[%s3711_s1 + $0x128] sm:$0xff]  }
  0x12   :  { %2249 = vmatprep.subr.bf16.mxu1 %v2748_v17  ;;  %v2780_v48 = vld [vmem:[%s3711_s1 + $0x198] sm:$0xff]   ;;  %v2783_v51 = vld [vmem:[%s3711_s1 + $0x1a0] sm:$0xff]   ;;  %v2786_v54 = vld [vmem:[%s3711_s1 + $0x1a8] sm:$0xff]  }
  0x13   :  { %v2787_v55 = vld [vmem:[%s3711_s1 + $0x170] sm:$0xff]   ;;  %v2790_v58 = vld [vmem:[%s3711_s1 + $0x178] sm:$0xff]   ;;  %v2796_v62 = vld [vmem:[%s3711_s1 + $0x200] sm:$0xff]  }
  0x14   :  { %2228 = vmatpush3.bf16.msra.mxu0 %v2749_v18  ;;  %v2788_v56 = vld [vmem:[%s3711_s1 + $0x130] sm:$0xff]   ;;  %v2791_v60 = vld [vmem:[%s3711_s1 + $0x138] sm:$0xff]   ;;  %v2797_v0 = vld [vmem:[%s3711_s1 + $0x280] sm:$0xff]  }
  0x15   :  { %2250 = vmatpush3.bf16.msra.mxu1 %v2750_v19  ;;  %2229 = vmatprep.subr.bf16.mxu0 %v2751_v20  ;;  %v2789_v57 = vld [vmem:[%s3711_s1 + $0x1b0] sm:$0xff]   ;;  %v2792_v61 = vld [vmem:[%s3711_s1 + $0x1b8] sm:$0xff]   ;;  %v2799_v2 = vld [vmem:[%s3711_s1 + $0x1c0] sm:$0xff]  }
  0x16   :  { %2251 = vmatprep.subr.bf16.mxu1 %v2752_v21  ;;  %v2795_v59 = vld [vmem:[%s3710_s0 + $0x14] ss:$28 sps:$4 sm:$0xff]   ;;  %v2800_v3 = vld [vmem:[%s3711_s1 + $0x240] sm:$0xff]   ;;  %v2801_v4 = vld [vmem:[%s3711_s1 + $0x208] sm:$0xff]  }
  0x17   :  { %v2793_v63 = vld [vmem:[%s3710_s0 + $0x10] ss:$28 sps:$4 sm:$0xff]   ;;  %v2798_v1 = vld [vmem:[%s3710_s0 + $0x18] ss:$28 sps:$4 sm:$0xff]   ;;  %v2813_v16 = vld [vmem:[%s3711_s1 + $0x220] sm:$0xff]  }
  0x18   :  { %2230 = vmatpush3.bf16.msra.mxu0 %v2753_v22  ;;  %v2802_v5 = vld [vmem:[%s3711_s1 + $0x288] sm:$0xff]   ;;  %v2805_v8 = vld [vmem:[%s3711_s1 + $0x210] sm:$0xff]   ;;  %v2809_v12 = vld [vmem:[%s3711_s1 + $0x218] sm:$0xff]  }
  0x19   :  { %2252 = vmatpush3.bf16.msra.mxu1 %v2754_v23  ;;  %2231 = vmatprep.subr.bf16.mxu0 %v2755_v24  ;;  %v2803_v6 = vld [vmem:[%s3711_s1 + $0x1c8] sm:$0xff]   ;;  %v2806_v9 = vld [vmem:[%s3711_s1 + $0x290] sm:$0xff]   ;;  %v2810_v13 = vld [vmem:[%s3711_s1 + $0x298] sm:$0xff]  }
  0x1a   :  { %2253 = vmatprep.subr.bf16.mxu1 %v2756_v25  ;;  %v2804_v7 = vld [vmem:[%s3711_s1 + $0x248] sm:$0xff]   ;;  %v2807_v10 = vld [vmem:[%s3711_s1 + $0x1d0] sm:$0xff]   ;;  %v2811_v14 = vld [vmem:[%s3711_s1 + $0x1d8] sm:$0xff]  }
  0x1b   :  { %v2808_v11 = vld [vmem:[%s3711_s1 + $0x250] sm:$0xff]   ;;  %v2812_v15 = vld [vmem:[%s3711_s1 + $0x258] sm:$0xff]   ;;  %v2814_v17 = vld [vmem:[%s3711_s1 + $0x2a0] sm:$0xff]  }
  0x1c   :  { %2232 = vmatpush3.bf16.msra.mxu0 %v2757_v26  ;;  %v2815_v18 = vld [vmem:[%s3711_s1 + $0x1e0] sm:$0xff]   ;;  %v2817_v20 = vld [vmem:[%s3711_s1 + $0x228] sm:$0xff]   ;;  %v2821_v24 = vld [vmem:[%s3711_s1 + $0x230] sm:$0xff]  }
  0x1d   :  { %2254 = vmatpush3.bf16.msra.mxu1 %v2758_v27  ;;  %2233 = vmatprep.subr.bf16.mxu0 %v2759_v28  ;;  %v2816_v19 = vld [vmem:[%s3711_s1 + $0x260] sm:$0xff]   ;;  %v2818_v21 = vld [vmem:[%s3711_s1 + $0x2a8] sm:$0xff]   ;;  %v2822_v25 = vld [vmem:[%s3711_s1 + $0x2b0] sm:$0xff]  }
  0x1e   :  { %2255 = vmatprep.subr.bf16.mxu1 %v2760_v29  ;;  %v2819_v22 = vld [vmem:[%s3711_s1 + $0x1e8] sm:$0xff]   ;;  %v2823_v26 = vld [vmem:[%s3711_s1 + $0x1f0] sm:$0xff]   ;;  %v2825_v28 = vld [vmem:[%s3711_s1 + $0x238] sm:$0xff]  }
  0x1f   :  { %v2820_v23 = vld [vmem:[%s3711_s1 + $0x268] sm:$0xff]   ;;  %v2824_v27 = vld [vmem:[%s3711_s1 + $0x270] sm:$0xff]   ;;  %v2826_v29 = vld [vmem:[%s3711_s1 + $0x2b8] sm:$0xff]  }
  0x20   :  { %2234 = vmatpush3.bf16.msra.mxu0 %v2761_v30  ;;  %v2827_v30 = vld [vmem:[%s3711_s1 + $0x1f8] sm:$0xff]  }
  0x21   :  { %2256 = vmatpush3.bf16.msra.mxu1 %v2762_v31  ;;  %2263 = vmatprep.subr.bf16.mxu0 %v2769_v37  ;;  %v2828_v31 = vld [vmem:[%s3711_s1 + $0x278] sm:$0xff]   ;;  %v2835_v37 = vld [vmem:[%s3711_s1 + $0x300] sm:$0xff]  }
  0x22   :  { %2440 = vmatprep.subr.bf16.mxu1 %v2933_v36  ;;  %v2829_v33 = vld [vmem:[%s3710_s0 + $0x38] ss:$28 sps:$4 sm:$0xff]   ;;  %v2832_v35 = vld [vmem:[%s3710_s0 + $0x40] ss:$28 sps:$4 sm:$0xff]  }
  0x23   :  { %706 = vmatmul.mubr.bf16.vlgmr.msra.gmra.mrb[0].mxu0 %v2763_v32  ;;  %v2831_v32 = vld [vmem:[%s3710_s0 + $0x3c] ss:$28 sps:$4 sm:$0xff]  }
  0x24   :  { %747 = vmatmul.mubr.bf16.vlgmr.msra.gmra.mrb[0].mxu1 %v2766_v34  ;;  %2264 = vmatpush3.bf16.msra.mxu0 %v2770_v38  ;;  %v2834_v34 = vld [vmem:[%s3710_s0 + $0x44] ss:$28 sps:$4 sm:$0xff]  }
  0x25   :  { %2456 = vmatprep.mubr.msk.bf16.mxu1 %vm2934_vm0, %v2933_v36  ;;  %2441 = vmatpush3.bf16.msra.mxu1 %v2771_v39  ;;  %v2836_v38 = vld [vmem:[%s3711_s1 + $0x2c0] sm:$0xff]  }
  0x26   :  { %2265 = vmatprep.subr.bf16.mxu0 %v2772_v40  ;;  %2442 = vmatprep.subr.bf16.mxu1 %v2933_v36  ;;  %v2837_v39 = vld [vmem:[%s3711_s1 + $0x340] sm:$0xff]   ;;  %v2838_v40 = vld [vmem:[%s3711_s1 + $0x308] sm:$0xff]  }
  0x27   :  { %787 = vmatprep.mubr.bf16.mxu0 %v2795_v59 }
  0x28   :  { %2266 = vmatpush3.bf16.msra.mxu0 %v2773_v41  ;;  %v2839_v41 = vld [vmem:[%s3711_s1 + $0x2c8] sm:$0xff]  }
  0x29   :  { %2443 = vmatpush3.bf16.msra.mxu1 %v2774_v42  ;;  %2267 = vmatprep.subr.bf16.mxu0 %v2775_v43  ;;  %v2840_v42 = vld [vmem:[%s3711_s1 + $0x348] sm:$0xff]   ;;  %v2841_v43 = vld [vmem:[%s3711_s1 + $0x310] sm:$0xff]  }
  0x2a   :  { %2444 = vmatprep.subr.bf16.mxu1 %v2933_v36 }
  0x2c   :  { %2268 = vmatpush3.bf16.msra.mxu0 %v2776_v44  ;;  %v2842_v44 = vld [vmem:[%s3711_s1 + $0x2d0] sm:$0xff]  }
  0x2d   :  { %2445 = vmatpush3.bf16.msra.mxu1 %v2777_v45  ;;  %2269 = vmatprep.subr.bf16.mxu0 %v2778_v46  ;;  %v2843_v45 = vld [vmem:[%s3711_s1 + $0x350] sm:$0xff]   ;;  %v2844_v46 = vld [vmem:[%s3711_s1 + $0x318] sm:$0xff]  }
  0x2e   :  { %2446 = vmatprep.subr.bf16.mxu1 %v2933_v36 }
  0x30   :  { %2270 = vmatpush3.bf16.msra.mxu0 %v2779_v47  ;;  %v2845_v47 = vld [vmem:[%s3711_s1 + $0x2d8] sm:$0xff]  }
  0x31   :  { %2447 = vmatpush3.bf16.msra.mxu1 %v2780_v48  ;;  %2271 = vmatprep.subr.bf16.mxu0 %v2781_v49  ;;  %v2846_v48 = vld [vmem:[%s3711_s1 + $0x358] sm:$0xff]   ;;  %v2847_v49 = vld [vmem:[%s3711_s1 + $0x320] sm:$0xff]  }
  0x32   :  { %2448 = vmatprep.subr.bf16.mxu1 %v2933_v36 }
  0x34   :  { %2272 = vmatpush3.bf16.msra.mxu0 %v2782_v50  ;;  %v2848_v50 = vld [vmem:[%s3711_s1 + $0x2e0] sm:$0xff]  }
  0x35   :  { %2449 = vmatpush3.bf16.msra.mxu1 %v2783_v51  ;;  %2273 = vmatprep.subr.bf16.mxu0 %v2784_v52  ;;  %v2849_v51 = vld [vmem:[%s3711_s1 + $0x360] sm:$0xff]   ;;  %v2850_v52 = vld [vmem:[%s3711_s1 + $0x328] sm:$0xff]  }
  0x36   :  { %2450 = vmatprep.subr.bf16.mxu1 %v2933_v36 }
  0x38   :  { %2274 = vmatpush3.bf16.msra.mxu0 %v2785_v53  ;;  %v2851_v53 = vld [vmem:[%s3711_s1 + $0x2e8] sm:$0xff]  }
  0x39   :  { %2451 = vmatpush3.bf16.msra.mxu1 %v2786_v54  ;;  %2275 = vmatprep.subr.bf16.mxu0 %v2787_v55  ;;  %v2852_v54 = vld [vmem:[%s3711_s1 + $0x368] sm:$0xff]   ;;  %v2853_v55 = vld [vmem:[%s3711_s1 + $0x330] sm:$0xff]  }
  0x3a   :  { %2452 = vmatprep.subr.bf16.mxu1 %v2933_v36 }
  0x3c   :  { %2276 = vmatpush3.bf16.msra.mxu0 %v2788_v56  ;;  %v2860_v56 = vld [vmem:[%s3710_s0 + $0x4c] ss:$28 sps:$4 sm:$0xff]  }
  0x3d   :  { %2453 = vmatpush3.bf16.msra.mxu1 %v2789_v57  ;;  %2277 = vmatprep.subr.bf16.mxu0 %v2790_v58  ;;  %v2854_v57 = vld [vmem:[%s3711_s1 + $0x2f0] sm:$0xff]  }
  0x3e   :  { %2454 = vmatprep.subr.bf16.mxu1 %v2933_v36 }
  0x40   :  { %2278 = vmatpush3.bf16.msra.mxu0 %v2791_v60 }
  0x41   :  { %2455 = vmatpush3.bf16.msra.mxu1 %v2792_v61  ;;  %2294 = vmatprep.subr.bf16.mxu0 %v2796_v62 }
  0x42   :  { %2316 = vmatprep.subr.bf16.mxu1 %v2797_v0 }
  0x43   :  { %788 = vmatmul.mubr.bf16.vlgmr.msra.gmra.mrb[4].mxu0 %v2793_v63 }
  0x44   :  { %2457 = vmatmul.mubr.bf16.vlgmr.msra.gmra.mrb[4].mxu1 %v2798_v1  ;;  %2295 = vmatpush3.bf16.msra.mxu0 %v2799_v2 }
  0x45   :  { %2317 = vmatpush3.bf16.msra.mxu1 %v2800_v3  ;;  %2296 = vmatprep.subr.bf16.mxu0 %v2801_v4 }
  0x46   :  { %2318 = vmatprep.subr.bf16.mxu1 %v2802_v5  ;;  %1248 = vmatprep.mubr.bf16.mxu0 %v2831_v32 }
  0x47   :  { %1289 = vmatprep.mubr.bf16.mxu1 %v2834_v34 }
  0x48   :  { %2297 = vmatpush3.bf16.msra.mxu0 %v2803_v6 }
  0x49   :  { %2319 = vmatpush3.bf16.msra.mxu1 %v2804_v7  ;;  %2298 = vmatprep.subr.bf16.mxu0 %v2805_v8 }
  0x4a   :  { %2320 = vmatprep.subr.bf16.mxu1 %v2806_v9 }
  0x4c   :  { %2299 = vmatpush3.bf16.msra.mxu0 %v2807_v10 }
  0x4d   :  { %2321 = vmatpush3.bf16.msra.mxu1 %v2808_v11  ;;  %2300 = vmatprep.subr.bf16.mxu0 %v2809_v12 }
  0x4e   :  { %2322 = vmatprep.subr.bf16.mxu1 %v2810_v13 }
  0x50   :  { %2301 = vmatpush3.bf16.msra.mxu0 %v2811_v14 }
  0x51   :  { %2323 = vmatpush3.bf16.msra.mxu1 %v2812_v15  ;;  %2302 = vmatprep.subr.bf16.mxu0 %v2813_v16 }
  0x52   :  { %2324 = vmatprep.subr.bf16.mxu1 %v2814_v17 }
  0x54   :  { %2303 = vmatpush3.bf16.msra.mxu0 %v2815_v18 }
  0x55   :  { %2325 = vmatpush3.bf16.msra.mxu1 %v2816_v19  ;;  %2304 = vmatprep.subr.bf16.mxu0 %v2817_v20 }
  0x56   :  { %2326 = vmatprep.subr.bf16.mxu1 %v2818_v21 }
  0x58   :  { %2305 = vmatpush3.bf16.msra.mxu0 %v2819_v22 }
  0x59   :  { %2327 = vmatpush3.bf16.msra.mxu1 %v2820_v23  ;;  %2306 = vmatprep.subr.bf16.mxu0 %v2821_v24 }
  0x5a   :  { %2328 = vmatprep.subr.bf16.mxu1 %v2822_v25 }
  0x5c   :  { %2307 = vmatpush3.bf16.msra.mxu0 %v2823_v26 }
  0x5d   :  { %2329 = vmatpush3.bf16.msra.mxu1 %v2824_v27  ;;  %2308 = vmatprep.subr.bf16.mxu0 %v2825_v28 }
  0x5e   :  { %2330 = vmatprep.subr.bf16.mxu1 %v2826_v29 }
  0x60   :  { %2309 = vmatpush3.bf16.msra.mxu0 %v2827_v30 }
  0x61   :  { %2331 = vmatpush3.bf16.msra.mxu1 %v2828_v31  ;;  %2338 = vmatprep.subr.bf16.mxu0 %v2835_v37 }
  0x62   :  { %2460 = vmatprep.subr.bf16.mxu1 %v2933_v36 }
  0x63   :  { %1249 = vmatmul.mubr.bf16.vlgmr.msra.gmra.mrb[8].mxu0 %v2829_v33 }
  0x64   :  { %1290 = vmatmul.mubr.bf16.vlgmr.msra.gmra.mrb[8].mxu1 %v2832_v35  ;;  %2339 = vmatpush3.bf16.msra.mxu0 %v2836_v38 }
  0x65   :  { %2461 = vmatpush3.bf16.msra.mxu1 %v2837_v39  ;;  %2340 = vmatprep.subr.bf16.mxu0 %v2838_v40 }
  0x66   :  { %2462 = vmatprep.subr.bf16.mxu1 %v2933_v36  ;;  %2476 = vmatprep.mubr.msk.bf16.mxu1 %vm2934_vm0, %v2933_v36 }
  0x67   :  { %1330 = vmatprep.mubr.bf16.mxu0 %v2860_v56 }
  0x68   :  { %2341 = vmatpush3.bf16.msra.mxu0 %v2839_v41 }
  0x69   :  { %2463 = vmatpush3.bf16.msra.mxu1 %v2840_v42  ;;  %2342 = vmatprep.subr.bf16.mxu0 %v2841_v43 }
  0x6a   :  { %2464 = vmatprep.subr.bf16.mxu1 %v2933_v36 }
  0x6c   :  { %2343 = vmatpush3.bf16.msra.mxu0 %v2842_v44 }
  0x6d   :  { %2465 = vmatpush3.bf16.msra.mxu1 %v2843_v45  ;;  %2344 = vmatprep.subr.bf16.mxu0 %v2844_v46 }
  0x6e   :  { %2466 = vmatprep.subr.bf16.mxu1 %v2933_v36 }
  0x70   :  { %2345 = vmatpush3.bf16.msra.mxu0 %v2845_v47 }
  0x71   :  { %2467 = vmatpush3.bf16.msra.mxu1 %v2846_v48  ;;  %2346 = vmatprep.subr.bf16.mxu0 %v2847_v49 }
  0x72   :  { %2468 = vmatprep.subr.bf16.mxu1 %v2933_v36 }
  0x74   :  { %2347 = vmatpush3.bf16.msra.mxu0 %v2848_v50 }
  0x75   :  { %2469 = vmatpush3.bf16.msra.mxu1 %v2849_v51  ;;  %2348 = vmatprep.subr.bf16.mxu0 %v2850_v52 }
  0x76   :  { %2470 = vmatprep.subr.bf16.mxu1 %v2933_v36 }
  0x78   :  { %2349 = vmatpush3.bf16.msra.mxu0 %v2851_v53 }
  0x79   :  { %20 = vsyncpa [#allocation7], 0  ;;  %2471 = vmatpush3.bf16.msra.mxu1 %v2852_v54  ;;  %2350 = vmatprep.subr.bf16.mxu0 %v2853_v55  ;;  %v2855_v58 = vld [vmem:[%s3711_s1 + $0x370] sm:$0xff]   ;;  %v2856_v59 = vld [vmem:[%s3711_s1 + $0x338] sm:$0xff]   ;;  %vm56_vm1 = vcmask 261120   ;;  %vm50_vm2 = vcmask 254976  }
  0x7a   :  { %2472 = vmatprep.subr.bf16.mxu1 %v2933_v36  ;;  %v2857_v60 = vld [vmem:[%s3711_s1 + $0x2f8] sm:$0xff]   ;;  %v2858_v62 = vld [vmem:[%s3710_s0 + $0x48] ss:$28 sps:$4 sm:$0xff]   ;;  %v2862_v63 = vld [vmem:[%s3710_s0 + $0x50] ss:$28 sps:$4 sm:$0xff]   ;;  %57 = vst.msk [vmem:[#allocation2] sm:$0xff] %vm56_vm1, %v2933_v36 }
  0x7b   :  { %v2861_v61 = vld [vmem:[%s3711_s1 + $0x378] sm:$0xff]   ;;  %58 = vst.msk [vmem:[#allocation2 + $0x8] sm:$0xff] %vm56_vm1, %v2933_v36  ;;  %59 = vst.msk [vmem:[#allocation2 + $0x10] sm:$0xff] %vm56_vm1, %v2933_v36  ;;  %v1466_v0 = vld [vmem:[%s3713_s3] sm:$0xff]  ;;  %v2935_v3 = vmov 0.0|0.0   ;;  %vm1450_vm3 = vcmask 1041409  }
  0x7c   :  { %2351 = vmatpush3.bf16.msra.mxu0 %v2854_v57  ;;  %60 = vst.msk [vmem:[#allocation2 + $0x18] sm:$0xff] %vm56_vm1, %v2933_v36  ;;  %v1467_v1 = vld [vmem:[%s3713_s3 + $0x8] sm:$0xff]  ;;  %v1468_v2 = vld [vmem:[%s3713_s3 + $0x10] sm:$0xff]  ;;  %v1469_v5 = vld [vmem:[%s3713_s3 + $0x18] sm:$0xff]  ;;  %vm1718_vm4 = vcmask 9216  }
  0x7d   :  { %2473 = vmatpush3.bf16.msra.mxu1 %v2855_v58  ;;  %2352 = vmatprep.subr.bf16.mxu0 %v2856_v59  ;;  %51 = vst.msk [vmem:[#allocation3] sm:$0x3] %vm50_vm2, %v2933_v36  ;;  %52 = vst.msk [vmem:[#allocation3 + $0x2] sm:$0x3] %vm50_vm2, %v2933_v36  ;;  %v3433_v4 = vpack.c.bf16 %v1467_v1, %v1466_v0  ;;  %v3440_v6 = vpack.c.bf16 %v1469_v5, %v1468_v2  ;;  %v1471_v21 = vld [vmem:[%s3715_s5] sm:$0xff]  ;;  %v1472_v22 = vld [vmem:[%s3715_s5 + $0x8] sm:$0xff] }
  0x7e   :  { %2474 = vmatprep.subr.bf16.mxu1 %v2933_v36  ;;  %v1473_v23 = vld [vmem:[%s3715_s5 + $0x10] sm:$0xff]  ;;  %v3454_v24 = vpack.c.bf16 %v1472_v22, %v1471_v21  ;;  %v1474_v25 = vld [vmem:[%s3715_s5 + $0x18] sm:$0xff]  ;;  %v1475_v27 = vld [vmem:[%s3715_s5 + $0x20] sm:$0xff] }
  0x7f   :  { %v3460_v26 = vpack.c.bf16 %v1474_v25, %v1473_v23  ;;  %v1476_v28 = vld [vmem:[%s3715_s5 + $0x28] sm:$0xff]  ;;  %v1477_v30 = vld [vmem:[%s3715_s5 + $0x30] sm:$0xff]  ;;  %v1478_v31 = vld [vmem:[%s3715_s5 + $0x38] sm:$0xff] }
  0x80   :  { %2353 = vmatpush3.bf16.msra.mxu0 %v2857_v60  ;;  %v3470_v29 = vpack.c.bf16 %v1476_v28, %v1475_v27  ;;  %v3480_v32 = vpack.c.bf16 %v1478_v31, %v1477_v30  ;;  %v1479_v33 = vld [vmem:[%s3715_s5 + $0x40] sm:$0xff]  ;;  %v1480_v34 = vld [vmem:[%s3715_s5 + $0x48] sm:$0xff]  ;;  %v1481_v43 = vld [vmem:[%s3715_s5 + $0x50] sm:$0xff] }
  0x81   :  { %2475 = vmatpush3.bf16.msra.mxu1 %v2861_v61  ;;  %2641 = vmatprep.subr.bf16.mxu0 %v2935_v3  ;;  %v3490_v39 = vpack.c.bf16 %v1480_v34, %v1479_v33  ;;  %v1482_v44 = vld [vmem:[%s3715_s5 + $0x58] sm:$0xff]  ;;  %v837_v50 = vld [vmem:[#allocation2] sm:$0xff]  ;;  %v1484_v55 = vld [vmem:[%s3715_s5 + $0x68] sm:$0xff] }
  0x82   :  { %2629 = vmatprep.subr.bf16.mxu1 %v2935_v3  ;;  %v3500_v51 = vpack.c.bf16 %v1482_v44, %v1481_v43  ;;  %v1483_v54 = vld [vmem:[%s3715_s5 + $0x60] sm:$0xff]  ;;  %v838_v56 = vld [vmem:[#allocation2 + $0x8] sm:$0xff] }
  0x83   :  { %1331 = vmatmul.mubr.bf16.vlgmr.msra.gmra.mrb[12].mxu0 %v2858_v62  ;;  %v3510_v59 = vpack.c.bf16 %v1484_v55, %v1483_v54  ;;  %v2209_v61 = vld [vmem:[%s3712_s2] ss:$0 sm:$0xff] }
  0x84   :  { %2477 = vmatmul.mubr.bf16.vlgmr.msra.gmra.mrb[12].mxu1 %v2862_v63  ;;  %2534 = vmatprep.mubr.msk.f32.mxu0 %vm2934_vm0, %v2933_v36  ;;  %v1416_v34 = vld [vmem:[#allocation3] sm:$0x3] }
  0x85   :  { %2488 = vmatprep.mubr.msk.f32.mxu1 %vm2934_vm0, %v2933_v36  ;;  %2631 = vmatpush3.bf16.msra.mxu1 %v3433_v4 }
  0x86   :  { %2632 = vmatprep.subr.bf16.mxu1 %v2935_v3  ;;  %2643 = vmatpush3.bf16.msra.mxu0 %v3454_v24 }
  0x87   :  { %2644 = vmatprep.subr.bf16.mxu0 %v2935_v3 }
  0x89   :  { %2634 = vmatpush3.bf16.msra.mxu1 %v3440_v6 }
  0x8a   :  { %2635 = vmatprep.subr.bf16.mxu1 %v2935_v3  ;;  %2646 = vmatpush3.bf16.msra.mxu0 %v3460_v26 }
  0x8b   :  { %2647 = vmatprep.subr.bf16.mxu0 %v2935_v3 }
  0x8e   :  { %2649 = vmatpush3.bf16.msra.mxu0 %v3470_v29 }
  0x8f   :  { %2650 = vmatprep.subr.bf16.mxu0 %v2935_v3 }
  0x92   :  { %2652 = vmatpush3.bf16.msra.mxu0 %v3480_v32 }
  0x93   :  { %2653 = vmatprep.subr.bf16.mxu0 %v2935_v3 }
  0x96   :  { %2655 = vmatpush3.bf16.msra.mxu0 %v3490_v39 }
  0x97   :  { %2656 = vmatprep.subr.bf16.mxu0 %v2935_v3 }
  0x9a   :  { %2658 = vmatpush3.bf16.msra.mxu0 %v3500_v51 }
  0x9b   :  { %2659 = vmatprep.subr.bf16.mxu0 %v2935_v3 }
  0x9e   :  { %2661 = vmatpush3.bf16.msra.mxu0 %v3510_v59 }
  0x9f   :  { %2662 = vmatprep.subr.bf16.mxu0 %v2935_v3 }
  0xf6   :  { %v2235_v7 = vpop.f32.mrb[0].mxu0 }
  0xf7   :  { %v2257_v8 = vpop.f32.mrb[0].mxu1  ;;  %v2236_v9 = vpop.f32.mrb[1].mxu0 }
  0xf8   :  { %v2237_v10 = vadd.f32 %v2236_v9, %v2235_v7  ;;  %v2258_v11 = vpop.f32.mrb[1].mxu1  ;;  %v2238_v12 = vpop.f32.mrb[2].mxu0 }
  0xf9   :  { %v2259_v13 = vadd.f32 %v2258_v11, %v2257_v8  ;;  %v2260_v14 = vpop.f32.mrb[2].mxu1  ;;  %v2239_v15 = vpop.f32.mrb[3].mxu0 }
  0xfa   :  { %v2240_v16 = vadd.f32 %v2239_v15, %v2238_v12  ;;  %v2261_v17 = vpop.f32.mrb[3].mxu1 }
  0xfb   :  { %v749_v18 = vadd.f32 %v2259_v13, %v2237_v10  ;;  %v2262_v19 = vadd.f32 %v2261_v17, %v2260_v14 }
  0xfd   :  { %v752_v20 = vadd.f32 %v2262_v19, %v2240_v16 }
 0x116   :  { %v2279_v35 = vpop.f32.mrb[4].mxu0 }
 0x117   :  { %v2280_v37 = vpop.f32.mrb[5].mxu0  ;;  %v830_v38 = vpop.f32.mrb[4].mxu1 }
 0x118   :  { %v2281_v40 = vadd.f32 %v2280_v37, %v2279_v35  ;;  %v2282_v41 = vpop.f32.mrb[6].mxu0  ;;  %v2458_v42 = vpop.f32.mrb[5].mxu1 }
 0x119   :  { %v2283_v45 = vpop.f32.mrb[7].mxu0  ;;  %v833_v46 = vpop.f32.mrb[6].mxu1 }
 0x11a   :  { %v2284_v47 = vadd.f32 %v2283_v45, %v2282_v41  ;;  %v790_v48 = vadd.f32 %v2281_v40, %v749_v18  ;;  %v2459_v49 = vpop.f32.mrb[7].mxu1 }
 0x11c   :  { %v831_v52 = vadd.f32 %v830_v38, %v790_v48  ;;  %v793_v53 = vadd.f32 %v2284_v47, %v752_v20 }
 0x11e   :  { %v839_v57 = vadd.f32 %v837_v50, %v831_v52  ;;  %v834_v58 = vadd.f32 %v833_v46, %v793_v53 }
 0x120   :  { %842 = vst.msk [vmem:[#allocation2] sm:$0xff] %vm56_vm1, %v839_v57  ;;  %v840_v60 = vadd.f32 %v838_v56, %v834_v58  ;;  %v1381_v57 = vld [vmem:[#allocation2 + $0x10] sm:$0xff] }
 0x122   :  { %843 = vst.msk [vmem:[#allocation2 + $0x8] sm:$0xff] %vm56_vm1, %v840_v60 }
 0x127   :  { %v1392_v62 = vld [vmem:[#allocation2] sm:$0xff] }
 0x128   :  { %v1408_v63 = vadd.f32 %v2209_v61, %v1392_v62 }
 0x129   :  { %v1393_v0 = vld [vmem:[#allocation2 + $0x8] sm:$0xff] }
 0x12a   :  { %v1412_v1 = vmax.f32 %v1408_v63, 0.0  ;;  %v1409_v2 = vadd.f32 %v2209_v61, %v1393_v0  ;;  %v1382_v61 = vld [vmem:[#allocation2 + $0x18] sm:$0xff]  ;;  %v2210_v0 = vld [vmem:[%s3712_s2 + $0x1] ss:$0 sm:$0xff] }
 0x12c   :  { %v1418_v5 = vsel %vm56_vm1, %v1412_v1, 0.0  ;;  %v1413_v7 = vmax.f32 %v1409_v2, 0.0 }
 0x12d   :  { %v1419_v8 = vrot.slane %v1418_v5, 4 }
 0x12e   :  { %v1425_v9 = vsel %vm56_vm1, %v1413_v7, 0.0 }
 0x12f   :  { %v1420_v10 = vadd.f32 %v1419_v8, %v1418_v5  ;;  %v1426_v11 = vrot.slane %v1425_v9, 4 }
 0x131   :  { %v1421_v12 = vrot.slane %v1420_v10, 2  ;;  %v1427_v13 = vadd.f32 %v1426_v11, %v1425_v9 }
 0x133   :  { %v1422_v14 = vadd.f32 %v1421_v12, %v1420_v10  ;;  %v1428_v15 = vrot.slane %v1427_v13, 2 }
 0x135   :  { %v1423_v16 = vrot.slane %v1422_v14, 1  ;;  %v1429_v17 = vadd.f32 %v1428_v15, %v1427_v13 }
 0x136   :  { %v2310_v18 = vpop.f32.mrb[8].mxu0 }
 0x137   :  { %v1430_v19 = vrot.slane %v1429_v17, 1  ;;  %v2332_v20 = vpop.f32.mrb[8].mxu1  ;;  %v2311_v21 = vpop.f32.mrb[9].mxu0  ;;  %v1424_v27 = vadd.f32 %v1423_v16, %v1422_v14 }
 0x138   :  { %v2312_v22 = vadd.f32 %v2311_v21, %v2310_v18  ;;  %v2333_v23 = vpop.f32.mrb[9].mxu1  ;;  %v2313_v25 = vpop.f32.mrb[10].mxu0 }
 0x139   :  { %v1431_v28 = vadd.f32 %v1430_v19, %v1429_v17  ;;  %v2334_v30 = vadd.f32 %v2333_v23, %v2332_v20  ;;  %v2335_v31 = vpop.f32.mrb[10].mxu1  ;;  %v2314_v33 = vpop.f32.mrb[11].mxu0 }
 0x13a   :  { %v2315_v35 = vadd.f32 %v2314_v33, %v2313_v25  ;;  %v2336_v37 = vpop.f32.mrb[11].mxu1  ;;  %v1417_v25 = vld [vmem:[#allocation3 + $0x2] sm:$0x3] }
 0x13b   :  { %v1292_v38 = vadd.f32 %v2334_v30, %v2312_v22  ;;  %v2337_v40 = vadd.f32 %v2336_v37, %v2335_v31  ;;  %v1451_v41 = vsel %vm1450_vm3, %v1431_v28, %v1424_v27 }
 0x13c   :  { %v1455_v42 = vadd.f32 %v1451_v41, %v1416_v34 }
 0x13d   :  { %v1295_v43 = vadd.f32 %v2337_v40, %v2315_v35  ;;  %v1796_v35 = vld [vmem:[%s3717_s7 + $0x28] sm:$0xff] }
 0x13e   :  { %1458 = vst.msk [vmem:[#allocation3] sm:$0x3] %vm50_vm2, %v1455_v42 }
 0x145   :  { %v1462_v44 = vld [vmem:[#allocation3] sm:$0x3] }
 0x146   :  { %v3524_v45 = vmul.f32 0.125, %v1462_v44  ;;  %v1798_v44 = vld [vmem:[%s3717_s7 + $0x38] sm:$0xff] }
 0x148   :  { %2489 = vmatmul.mubr.msk.f32.vlgmr.msra.gmra.mrb[16].mxu1 %vm56_vm1, %v3524_v45 }
 0x149   :  { %2637 = vmatpush3.bf16.msra.mxu1 %v3433_v4  ;;  %2499 = vmatprep.mubr.msk.f32.mxu1 %vm2934_vm0, %v2933_v36 }
 0x14a   :  { %2638 = vmatprep.subr.bf16.mxu1 %v2935_v3 }
 0x14d   :  { %2640 = vmatpush3.bf16.msra.mxu1 %v3440_v6 }
 0x14e   :  { %2665 = vmatprep.subr.bf16.mxu1 %v2935_v3 }
 0x156   :  { %v2354_v46 = vpop.f32.mrb[12].mxu0 }
 0x157   :  { %v2355_v47 = vpop.f32.mrb[13].mxu0  ;;  %v1373_v48 = vpop.f32.mrb[12].mxu1 }
 0x158   :  { %v2356_v49 = vadd.f32 %v2355_v47, %v2354_v46  ;;  %v2357_v50 = vpop.f32.mrb[14].mxu0  ;;  %v2478_v52 = vpop.f32.mrb[13].mxu1  ;;  %v1791_v47 = vld [vmem:[%s3717_s7] sm:$0xff] }
 0x159   :  { %v2358_v53 = vpop.f32.mrb[15].mxu0  ;;  %v1376_v54 = vpop.f32.mrb[14].mxu1  ;;  %v1794_v52 = vld [vmem:[%s3717_s7 + $0x18] sm:$0xff] }
 0x15a   :  { %v1333_v55 = vadd.f32 %v2356_v49, %v1292_v38  ;;  %v2359_v56 = vadd.f32 %v2358_v53, %v2357_v50  ;;  %v2479_v4 = vpop.f32.mrb[15].mxu1  ;;  %v1793_v50 = vld [vmem:[%s3717_s7 + $0x10] sm:$0xff] }
 0x15b   :  { %v2699_v53 = vpack.c.bf16 %v1794_v52, %v1793_v50 }
 0x15c   :  { %v1374_v58 = vadd.f32 %v1373_v48, %v1333_v55  ;;  %v1336_v60 = vadd.f32 %v2359_v56, %v1295_v43  ;;  %v1797_v43 = vld [vmem:[%s3717_s7 + $0x30] sm:$0xff]  ;;  %v1792_v48 = vld [vmem:[%s3717_s7 + $0x8] sm:$0xff] }
 0x15d   :  { %v2693_v46 = vpack.c.bf16 %v1798_v44, %v1797_v43  ;;  %v2696_v49 = vpack.c.bf16 %v1792_v48, %v1791_v47  ;;  %v1949_v55 = vld [vmem:[%s3719_s9 + $0x8] sm:$0xff]  ;;  %v1950_v56 = vld [vmem:[%s3719_s9 + $0x10] sm:$0xff] }
 0x15e   :  { %v1383_v62 = vadd.f32 %v1381_v57, %v1374_v58  ;;  %v1377_v63 = vadd.f32 %v1376_v54, %v1336_v60  ;;  %v1948_v54 = vld [vmem:[%s3719_s9] sm:$0xff]  ;;  %v1953_v58 = vld [vmem:[%s3719_s9 + $0x28] sm:$0xff] }
 0x15f   :  { %v2702_v4 = vpack.c.bf16 %v1949_v55, %v1948_v54 }
 0x160   :  { %1385 = vst.msk [vmem:[#allocation2 + $0x10] sm:$0xff] %vm56_vm1, %v1383_v62  ;;  %v1384_v6 = vadd.f32 %v1382_v61, %v1377_v63  ;;  %v1954_v61 = vld [vmem:[%s3719_s9 + $0x30] sm:$0xff]  ;;  %v1955_v62 = vld [vmem:[%s3719_s9 + $0x38] sm:$0xff] }
 0x161   :  { %v2711_v63 = vpack.c.bf16 %v1955_v62, %v1954_v61 }
 0x162   :  { %1386 = vst.msk [vmem:[#allocation2 + $0x18] sm:$0xff] %vm56_vm1, %v1384_v6  ;;  %v1956_v6 = vld [vmem:[%s3719_s9 + $0x40] sm:$0xff] }
 0x167   :  { %v1394_v1 = vld [vmem:[#allocation2 + $0x10] sm:$0xff] }
 0x168   :  { %v1410_v2 = vadd.f32 %v2210_v0, %v1394_v1 }
 0x169   :  { %v1395_v5 = vld [vmem:[#allocation2 + $0x18] sm:$0xff] }
 0x16a   :  { %v1414_v7 = vmax.f32 %v1410_v2, 0.0  ;;  %v1411_v8 = vadd.f32 %v2210_v0, %v1395_v5  ;;  %v1957_v0 = vld [vmem:[%s3719_s9 + $0x48] sm:$0xff]  ;;  %v1958_v2 = vld [vmem:[%s3719_s9 + $0x50] sm:$0xff]  ;;  %v1959_v5 = vld [vmem:[%s3719_s9 + $0x58] sm:$0xff] }
 0x16b   :  { %v2714_v1 = vpack.c.bf16 %v1957_v0, %v1956_v6 }
 0x16c   :  { %v1432_v9 = vsel %vm56_vm1, %v1414_v7, 0.0  ;;  %v1415_v10 = vmax.f32 %v1411_v8, 0.0  ;;  %v2717_v7 = vpack.c.bf16 %v1959_v5, %v1958_v2  ;;  %v1960_v8 = vld [vmem:[%s3719_s9 + $0x60] sm:$0xff] }
 0x16d   :  { %v1433_v11 = vrot.slane %v1432_v9, 4 }
 0x16e   :  { %v1439_v12 = vsel %vm56_vm1, %v1415_v10, 0.0 }
 0x16f   :  { %v1434_v13 = vadd.f32 %v1433_v11, %v1432_v9  ;;  %v1440_v14 = vrot.slane %v1439_v12, 4  ;;  %v1961_v9 = vld [vmem:[%s3719_s9 + $0x68] sm:$0xff]  ;;  %v1962_v11 = vld [vmem:[%s3719_s9 + $0x70] sm:$0xff] }
 0x170   :  { %v2720_v10 = vpack.c.bf16 %v1961_v9, %v1960_v8 }
 0x171   :  { %v1435_v15 = vrot.slane %v1434_v13, 2  ;;  %v1441_v16 = vadd.f32 %v1440_v14, %v1439_v12  ;;  %v1963_v12 = vld [vmem:[%s3719_s9 + $0x78] sm:$0xff]  ;;  %v2214_v14 = vld [vmem:[%s3716_s6] ss:$0 sm:$0xff]  ;;  %s2936_s6 = smov [#allocation6]  }
 0x172   :  { %s2058_s27 = sshll.u32 %s2936_s6, 4  ;;  %s2059_s27 = int_to_ptr.vmem [resolvable:$true] %s2058_s27 }
 0x173   :  { %v1436_v17 = vadd.f32 %v1435_v15, %v1434_v13  ;;  %v1442_v18 = vrot.slane %v1441_v16, 2  ;;  %v2723_v13 = vpack.c.bf16 %v1963_v12, %v1962_v11  ;;  %p2868_p1 = scmp.lt.s32.totalorder %s2059_s27, %s2059_s27 }
 0x175   :  { %v1437_v19 = vrot.slane %v1436_v17, 1  ;;  %v1443_v20 = vadd.f32 %v1442_v18, %v1441_v16 }
 0x177   :  { %v1444_v21 = vrot.slane %v1443_v20, 1  ;;  %v1438_v22 = vadd.f32 %v1437_v19, %v1436_v17 }
 0x179   :  { %v1445_v23 = vadd.f32 %v1444_v21, %v1443_v20 }
 0x17b   :  { %v1452_v27 = vsel %vm1450_vm3, %v1445_v23, %v1438_v22  ;;  %v2217_v23 = vld [vmem:[%s3718_s8] ss:$0 sm:$0xff] }
 0x17c   :  { %v1456_v28 = vadd.f32 %v1452_v27, %v1417_v25 }
 0x17e   :  { %1459 = vst.msk [vmem:[#allocation3 + $0x2] sm:$0x3] %vm50_vm2, %v1456_v28 }
 0x185   :  { %v1463_v30 = vld [vmem:[#allocation3 + $0x2] sm:$0x3] }
 0x186   :  { %v1465_v31 = vmul.f32 0.125, %v1463_v30 }
 0x188   :  { %2500 = vmatmul.mubr.msk.f32.vlgmr.msra.gmra.mrb[18].mxu1 %vm56_vm1, %v1465_v31 }
 0x189   :  { %2667 = vmatpush3.bf16.msra.mxu1 %v3454_v24  ;;  %2569 = vmatprep.mubr.msk.f32.mxu1 %vm2934_vm0, %v2933_v36  ;;  %v1485_v24 = vld [vmem:[%s3715_s5 + $0x70] sm:$0xff] }
 0x18a   :  { %2668 = vmatprep.subr.bf16.mxu1 %v2935_v3 }
 0x18d   :  { %2670 = vmatpush3.bf16.msra.mxu1 %v3460_v26  ;;  %v1486_v26 = vld [vmem:[%s3715_s5 + $0x78] sm:$0xff] }
 0x18e   :  { %2671 = vmatprep.subr.bf16.mxu1 %v2935_v3  ;;  %v2663_v33 = vpack.c.bf16 %v1486_v26, %v1485_v24 }
 0x190   :  { %2664 = vmatpush3.bf16.msra.mxu0 %v2663_v33 }
 0x191   :  { %2673 = vmatpush3.bf16.msra.mxu1 %v3470_v29  ;;  %2701 = vmatprep.subr.bf16.mxu0 %v2935_v3  ;;  %v2211_v29 = vld [vmem:[%s3714_s4] ss:$0 sm:$0xff]  ;;  %s2863_s4 = scalar_lea.vmem %s2059_s27, 32 }
 0x192   :  { %2674 = vmatprep.subr.bf16.mxu1 %v2935_v3  ;;  %p2864_p0 = scmp.ne.s32.totalorder %s2059_s27, %s2863_s4  ;;  %p2869_p2 = scmp.lt.s32.totalorder %s2863_s4, %s2863_s4 }
 0x194   :  { %p2870_p3 = por %p2869_p2, %p2868_p1 }
 0x195   :  { %2676 = vmatpush3.bf16.msra.mxu1 %v3480_v32 }
 0x196   :  { %2677 = vmatprep.subr.bf16.mxu1 %v2935_v3  ;;  %p2871_p4 = pnand %p2870_p3, %p2864_p0 }
 0x199   :  { %2679 = vmatpush3.bf16.msra.mxu1 %v3490_v39 }
 0x19a   :  { %2680 = vmatprep.subr.bf16.mxu1 %v2935_v3 }
 0x19d   :  { %2682 = vmatpush3.bf16.msra.mxu1 %v3500_v51 }
 0x19e   :  { %2683 = vmatprep.subr.bf16.mxu1 %v2935_v3 }
 0x1a1   :  { %2685 = vmatpush3.bf16.msra.mxu1 %v3510_v59  ;;  %v1795_v59 = vld [vmem:[%s3717_s7 + $0x20] sm:$0xff] }
 0x1a2   :  { %2686 = vmatprep.subr.bf16.mxu1 %v2935_v3  ;;  %v2690_v41 = vpack.c.bf16 %v1796_v35, %v1795_v59 }
 0x1a5   :  { %2688 = vmatpush3.bf16.msra.mxu1 %v2663_v33 }
 0x1a6   :  { %2689 = vmatprep.subr.bf16.mxu1 %v2935_v3 }
 0x21b   :  { %v1563_v32 = vpop.f32.mrb[16].mxu1 }
 0x21c   :  { %v1564_v39 = vadd.f32 %v2211_v29, %v1563_v32  ;;  %v2490_v34 = vpop.f32.mrb[17].mxu1 }
 0x21e   :  { %v1567_v51 = vmax.f32 %v1564_v39, 0.0 }
 0x220   :  { %2535 = vmatmul.mubr.f32.vlgmr.msra.gmra.mrb[16].mxu0 %v1567_v51 }
 0x221   :  { %2626 = vmatprep.mubr.msk.f32.mxu0 %vm2934_vm0, %v2933_v36  ;;  %2703 = vmatpush3.bf16.msra.mxu0 %v2702_v4 }
 0x222   :  { %2704 = vmatprep.subr.bf16.mxu0 %v2935_v3 }
 0x25b   :  { %v1637_v37 = vpop.f32.mrb[18].mxu1 }
 0x25c   :  { %v1638_v38 = vadd.f32 %v2211_v29, %v1637_v37  ;;  %v2501_v40 = vpop.f32.mrb[19].mxu1 }
 0x25e   :  { %v1641_v42 = vmax.f32 %v1638_v38, 0.0 }
 0x260   :  { %2570 = vmatmul.mubr.f32.vlgmr.msra.gmra.mrb[20].mxu1 %v1641_v42 }
 0x261   :  { %2691 = vmatpush3.bf16.msra.mxu1 %v2690_v41  ;;  %2580 = vmatprep.mubr.msk.f32.mxu1 %vm2934_vm0, %v2933_v36 }
 0x262   :  { %2692 = vmatprep.subr.bf16.mxu1 %v2935_v3 }
 0x265   :  { %2694 = vmatpush3.bf16.msra.mxu1 %v2693_v46 }
 0x266   :  { %2695 = vmatprep.subr.bf16.mxu1 %v2935_v3 }
 0x268   :  { %2581 = vmatmul.mubr.msk.f32.vlgmr.msra.gmra.mrb[22].mxu1 %vm56_vm1, %v1465_v31 }
 0x269   :  { %2697 = vmatpush3.bf16.msra.mxu1 %v2696_v49  ;;  %2591 = vmatprep.mubr.msk.f32.mxu1 %vm2934_vm0, %v2933_v36  ;;  %v1951_v36 = vld [vmem:[%s3719_s9 + $0x18] sm:$0xff] }
 0x26a   :  { %2698 = vmatprep.subr.bf16.mxu1 %v2935_v3  ;;  %v2705_v57 = vpack.c.bf16 %v1951_v36, %v1950_v56 }
 0x26c   :  { %2706 = vmatpush3.bf16.msra.mxu0 %v2705_v57 }
 0x26d   :  { %2700 = vmatpush3.bf16.msra.mxu1 %v2699_v53  ;;  %2707 = vmatprep.subr.bf16.mxu0 %v2935_v3 }
 0x270   :  { %2592 = vmatmul.mubr.msk.f32.vlgmr.msra.gmra.mrb[24].mxu1 %vm56_vm1, %v3524_v45  ;;  %v1952_v45 = vld [vmem:[%s3719_s9 + $0x20] sm:$0xff] }
 0x271   :  { %v2708_v60 = vpack.c.bf16 %v1953_v58, %v1952_v45 }
 0x273   :  { %2709 = vmatpush3.bf16.msra.mxu0 %v2708_v60 }
 0x274   :  { %2710 = vmatprep.subr.bf16.mxu0 %v2935_v3 }
 0x277   :  { %2712 = vmatpush3.bf16.msra.mxu0 %v2711_v63 }
 0x278   :  { %2713 = vmatprep.subr.bf16.mxu0 %v2935_v3 }
 0x27b   :  { %2715 = vmatpush3.bf16.msra.mxu0 %v2714_v1 }
 0x27c   :  { %2716 = vmatprep.subr.bf16.mxu0 %v2935_v3 }
 0x27f   :  { %2718 = vmatpush3.bf16.msra.mxu0 %v2717_v7 }
 0x280   :  { %2719 = vmatprep.subr.bf16.mxu0 %v2935_v3 }
 0x283   :  { %2721 = vmatpush3.bf16.msra.mxu0 %v2720_v10 }
 0x284   :  { %2722 = vmatprep.subr.bf16.mxu0 %v2935_v3 }
 0x287   :  { %2724 = vmatpush3.bf16.msra.mxu0 %v2723_v13 }
 0x2f3   :  { %v1714_v15 = vpop.f32.mrb[16].mxu0 }
 0x2f4   :  { %v1715_v16 = vadd.f32 %v2214_v14, %v1714_v15  ;;  %v2536_v17 = vpop.f32.mrb[17].mxu0 }
 0x2f6   :  { %1719 = vst.msk [vmem:[#allocation6] sm:$0x3] %vm1718_vm4, %v1715_v16 }
 0x333   :  { %v1786_v3 = vpop.f32.mrb[20].mxu1 }
 0x334   :  { %v1787_v18 = vadd.f32 %v2214_v14, %v1786_v3  ;;  %v2571_v19 = vpop.f32.mrb[21].mxu1 }
 0x336   :  { %1790 = vst.msk [vmem:[#allocation8] sm:$0x3] %vm1718_vm4, %v1787_v18 }
 0x33b   :  { %v1865_v20 = vpop.f32.mrb[22].mxu1 }
 0x33c   :  { %v2582_v21 = vpop.f32.mrb[23].mxu1 }
 0x343   :  { %v1935_v22 = vpop.f32.mrb[24].mxu1 }
 0x344   :  { %v1936_v25 = vadd.f32 %v1935_v22, %v1865_v20  ;;  %v2593_v27 = vpop.f32.mrb[25].mxu1 }
 0x346   :  { %v1946_v28 = vadd.f32 %v2217_v23, %v1936_v25 }
 0x348   :  { %v1947_v30 = vmax.f32 %v1946_v28, 0.0 }
 0x34a   :  { %2627 = vmatmul.mubr.f32.vlgmr.msra.gmra.mrb[18].mxu0 %v1947_v30 }
 0x34b   :  { %2874 = shalt.err (!%p2871_p4)
}
 0x34c   :  { %s2875_s29 = scalar_lea.hbm %s3722_s12, 32 }
 0x34d   :  { %p2876_p5 = scmp.ne.s32.totalorder %s3722_s12, %s2875_s29  ;;  %p2879_p6 = scmp.lt.u32.totalorder %s2875_s29, %s3722_s12 }
 0x34f   :  { %p2881_p7 = pnand %p2879_p6, %p2876_p5 }
 0x351   :  { %2884 = shalt.err (!%p2881_p7)
}
 0x352   :  { %2061 = dma.vmem_to_hbm [thread:$0]  %s2059_s27, 32, %s3722_s12, [#allocation7]  }
 0x353   :  { %s2937_s18 = smov [#allocation8]  }
 0x354   :  { %s2068_s19 = sshll.u32 %s2937_s18, 4  ;;  %s2069_s19 = int_to_ptr.vmem [resolvable:$true] %s2068_s19 }
 0x355   :  { %s2885_s20 = scalar_lea.vmem %s2069_s19, 32  ;;  %p2890_p9 = scmp.lt.s32.totalorder %s2069_s19, %s2069_s19 }
 0x356   :  { %p2886_p8 = scmp.ne.s32.totalorder %s2069_s19, %s2885_s20  ;;  %p2891_p10 = scmp.lt.s32.totalorder %s2885_s20, %s2885_s20 }
 0x358   :  { %p2892_p11 = por %p2891_p10, %p2890_p9 }
 0x35a   :  { %p2893_p12 = pnand %p2892_p11, %p2886_p8 }
 0x35c   :  { %2896 = shalt.err (!%p2893_p12)
}
 0x35d   :  { %s2897_s0 = scalar_lea.hbm %s3723_s13, 32 }
 0x35e   :  { %p2898_p13 = scmp.ne.s32.totalorder %s3723_s13, %s2897_s0  ;;  %p2901_p0 = scmp.lt.u32.totalorder %s2897_s0, %s3723_s13 }
 0x360   :  { %p2903_p1 = pnand %p2901_p0, %p2898_p13 }
 0x362   :  { %2906 = shalt.err (!%p2903_p1)
}
 0x363   :  { %2071 = dma.vmem_to_hbm [thread:$0]  %s2069_s19, 32, %s3723_s13, [#allocation7]   ;;  %v2218_v31 = vld [vmem:[%s3720_s10] ss:$0 sm:$0xff] }
 0x364   :  { %s2938_s9 = smov [#allocation4]  }
 0x365   :  { %s2048_s26 = sshll.u32 %s2938_s9, 4  ;;  %s2049_s26 = int_to_ptr.vmem [resolvable:$true] %s2048_s26 }
 0x366   :  { %s2907_s6 = scalar_lea.vmem %s2049_s26, 32  ;;  %p2912_p3 = scmp.lt.s32.totalorder %s2049_s26, %s2049_s26 }
 0x367   :  { %p2908_p2 = scmp.ne.s32.totalorder %s2049_s26, %s2907_s6  ;;  %p2913_p4 = scmp.lt.s32.totalorder %s2907_s6, %s2907_s6 }
 0x369   :  { %p2914_p5 = por %p2913_p4, %p2912_p3 }
 0x36b   :  { %p2915_p6 = pnand %p2914_p5, %p2908_p2 }
 0x41d   :  { %v2037_v24 = vpop.f32.mrb[18].mxu0 }
 0x41e   :  { %v2038_v26 = vadd.f32 %v2218_v31, %v2037_v24  ;;  %v2628_v33 = vpop.f32.mrb[19].mxu0 }
 0x420   :  { %2041 = vst.msk [vmem:[#allocation4] sm:$0x3] %vm1718_vm4, %v2038_v26 }
 0x421   :  { %2918 = shalt.err (!%p2915_p6)
}
 0x422   :  { %s2919_s4 = scalar_lea.hbm %s3721_s11, 32 }
 0x423   :  { %p2920_p7 = scmp.ne.s32.totalorder %s3721_s11, %s2919_s4  ;;  %p2923_p8 = scmp.lt.u32.totalorder %s2919_s4, %s3721_s11 }
 0x425   :  { %p2925_p9 = pnand %p2923_p8, %p2920_p7 }
 0x427   :  { %2928 = shalt.err (!%p2925_p9)
}
 0x428   :  { %2051 = dma.vmem_to_hbm [thread:$0]  %s2049_s26, 32, %s3721_s11, [#allocation5]  }
 0x429   :  { %2929 = dma.done.wait [#allocation5], 32  }
 0x42a   :  { %2930 = vsyncadd [#allocation5], 4294967264 }
 0x42b   :  { %2931 = dma.done.wait [#allocation7], 64  }
 0x42c   :  { %2932 = vsyncadd [#allocation7], 4294967232 }
 0x42d   :  { %2081 = vsyncpa [#allocation5], 1 }
 0x42e   :  { %2082 = vsyncpa [#allocation7], 1 }

</bundles_post_ra>
